<compile_context>
chip_gen: v7x
topology: tpu7x:2x2x1
jax: 0.10.0
libtpu: 0.0.40
codegen_flags: <defaults>
</compile_context>

<pallas_src>
import functools

import jax
import jax.numpy as jnp
from jax.experimental import pallas as pl
from jax.experimental.pallas import tpu as pltpu

block_size = 128   # matches the registered `tril` buffer in the module
n_embed = 384


def head_kernel(x_ref, w_ref, b_ref, o_ref, *, head_size):
    # x_ref: (Bb, T, C) bf16   w_ref: (C, 3*hs) bf16   b_ref: (1, 3*hs) f32
    # o_ref: (Bb, T, hs) f32
    Bb, T, C = x_ref.shape
    hs = head_size

    # --- fused QKV projection on the flattened (Bb*T, C) slab -------------
    # One MXU launch (N = 3*hs = 192 result lanes), f32 accumulation + bias.
    x2 = x_ref[...].reshape(Bb * T, C)
    qkv = jnp.dot(x2, w_ref[...], preferred_element_type=jnp.float32) + b_ref[...]
    qkv = qkv.reshape(Bb, T, 3 * hs)

    # C**-0.5 is already folded into the q columns of w_ref / b_ref.
    q = qkv[:, :, 0 * hs:1 * hs].astype(jnp.bfloat16)
    k = qkv[:, :, 1 * hs:2 * hs].astype(jnp.bfloat16)
    v = qkv[:, :, 2 * hs:3 * hs].astype(jnp.bfloat16)

    # --- attention scores: batched q @ k^T, f32 accumulation --------------
    s = jnp.einsum("bqd,bkd->bqk", q, k,
                   preferred_element_type=jnp.float32)        # (Bb, T, T)

    # --- causal (tril) mask from (T,1) vs (1,T) iota (no (T,T) iotas) ------
    row = jax.lax.broadcasted_iota(jnp.int32, (1, T, 1), 1)
    col = jax.lax.broadcasted_iota(jnp.int32, (1, 1, T), 2)
    s = jnp.where(row >= col, s, -jnp.inf)

    # --- numerically-stable softmax; normalize AFTER the PV matmul --------
    m = jnp.max(s, axis=-1, keepdims=True)
    p = jnp.exp(s - m)                                        # unnormalized
    l = jnp.sum(p, axis=-1, keepdims=True)                    # (Bb, T, 1)
    # TODO(synk): training-mode Dropout(0.2) would mask/scale `p` here.

    # --- weighted sum of values, then scale by 1/l on the (T,hs) output ----
    out = jnp.einsum("bqk,bkd->bqd", p.astype(jnp.bfloat16), v,
                     preferred_element_type=jnp.float32)      # (Bb, T, hs)
    out = out * pl.reciprocal(l, approx=True)
    o_ref[...] = out.astype(o_ref.dtype)


def head_forward(x, wq, bq, wk, bk, wv, bv):
    """x: (B, T, C); w*: (C, head_size); b*: (head_size,) -> (B, T, head_size)."""
    B, T, C = x.shape
    hs = wq.shape[1]
    assert T <= block_size, "module's tril buffer only covers block_size rows"
    scale = float(C) ** -0.5   # module scales by C**-0.5 (C = n_embed), not hs

    # Fold the score scale into the q projection (exact: (x@wq+bq)*scale @ kT)
    # and fuse the three projections into one (C, 3*hs) weight / (1, 3*hs) bias.
    # bf16 MXU inputs (halves weight/activation HBM+VMEM traffic); bias f32.
    w_qkv = jnp.concatenate([wq * scale, wk, wv], axis=1).astype(jnp.bfloat16)
    b_qkv = jnp.concatenate([bq * scale, bk, bv]).reshape(1, 3 * hs).astype(jnp.float32)
    x_b = x.astype(jnp.bfloat16)

    # >=2 parallel grid steps (v7x has 2 TCs), several batch elems per step
    # to amortize the ~0.35 us per-grid-step overhead.
    grid_b = 2 if (B % 2 == 0 and B >= 2) else 1
    Bb = B // grid_b

    # Advisory cost estimate so XLA can overlap neighbours with this kernel.
    flops = B * (2 * T * C * 3 * hs + 2 * 2 * T * T * hs)
    bytes_accessed = (B * T * C * 2            # x (bf16)
                      + C * 3 * hs * 2         # fused weight (bf16)
                      + 3 * hs * 4             # fused bias (f32)
                      + B * T * hs * 4)        # output (f32)
    cost = pl.CostEstimate(flops=flops, transcendentals=B * T * T,
                           bytes_accessed=bytes_accessed)

    # Output kept in x.dtype (f32) to match the PyTorch module; emitting bf16
    # would halve writeback if the downstream concat/proj accepts it.
    return pl.pallas_call(
        functools.partial(head_kernel, head_size=hs),
        out_shape=jax.ShapeDtypeStruct((B, T, hs), x.dtype),
        grid_spec=pltpu.PrefetchScalarGridSpec(
            num_scalar_prefetch=0,
            grid=(grid_b,),
            in_specs=[
                pl.BlockSpec((Bb, T, C), lambda i: (i, 0, 0)),     # x rows
                pl.BlockSpec((C, 3 * hs), lambda i: (0, 0)),       # fused W (resident)
                pl.BlockSpec((1, 3 * hs), lambda i: (0, 0)),       # fused bias (resident)
            ],
            out_specs=pl.BlockSpec((Bb, T, hs), lambda i: (i, 0, 0)),
        ),
        compiler_params=pltpu.CompilerParams(
            dimension_semantics=("parallel",),   # batch blocks are independent
        ),
        cost_estimate=cost,
    )(x_b, w_qkv, b_qkv)


def head_reference(x, wq, bq, wk, bk, wv, bv):
    """Pure-JAX f32 reference matching Head.forward in eval mode."""
    B, T, C = x.shape
    q = x @ wq + bq
    k = x @ wk + bk
    v = x @ wv + bv
    wei = jnp.einsum("btd,bsd->bts", q, k) * C ** -0.5
    mask = jnp.tril(jnp.ones((T, T), dtype=bool))
    wei = jnp.where(mask, wei, -jnp.inf)
    wei = jax.nn.softmax(wei, axis=-1)
    return wei @ v


if __name__ == "__main__":
    # Small shapes consistent with the module: n_embed=384, T=block_size=128,
    # head_size=64 (n_embed / 6 heads, as in bigram.py).
    B, T, C, hs = 4, 128, n_embed, 64

    key = jax.random.PRNGKey(0)
    kx, k1, k2, k3, k4, k5, k6 = jax.random.split(key, 7)
    bound = 1.0 / C ** 0.5   # nn.Linear default init range

    x = jax.random.normal(kx, (B, T, C), dtype=jnp.float32)
    wq = jax.random.uniform(k1, (C, hs), jnp.float32, -bound, bound)
    bq = jax.random.uniform(k2, (hs,), jnp.float32, -bound, bound)
    wk = jax.random.uniform(k3, (C, hs), jnp.float32, -bound, bound)
    bk = jax.random.uniform(k4, (hs,), jnp.float32, -bound, bound)
    wv = jax.random.uniform(k5, (C, hs), jnp.float32, -bound, bound)
    bv = jax.random.uniform(k6, (hs,), jnp.float32, -bound, bound)

    out = head_forward(x, wq, bq, wk, bk, wv, bv)
    out = jax.block_until_ready(out)

    ref = head_reference(x, wq, bq, wk, bk, wv, bv)
    assert out.shape == (B, T, hs)
    # bf16 MXU inputs with f32 accumulation -> loosened tolerance vs f32 ref.
    assert jnp.allclose(out, ref, atol=2e-2, rtol=2e-2)

    print("KERNEL_OK")
</pallas_src>

<mosaic_0001>
module attributes {stable_mosaic.version = 11 : i64} {
  func.func @head_kernel(%arg0: i32, %arg1: memref<2x128x384xbf16, #tpu.memory_space<vmem>>, %arg2: memref<384x192xbf16, #tpu.memory_space<vmem>>, %arg3: memref<1x192xf32, #tpu.memory_space<vmem>>, %arg4: memref<2x128x64xf32, #tpu.memory_space<vmem>>) attributes {dimension_semantics = [#tpu.dimension_semantics<parallel>], iteration_bounds = array<i64: 2>, scalar_prefetch = 0 : i64, scratch_operands = 0 : i64, tpu.core_type = #tpu.core_type<tc>, window_params = [{transform_indices = @transform_0, window_bounds = array<i64: 2, 128, 384>}, {pipeline_mode = #tpu.pipeline_mode<synchronous>, transform_indices = @transform_1, window_bounds = array<i64: 384, 192>}, {pipeline_mode = #tpu.pipeline_mode<synchronous>, transform_indices = @transform_2, window_bounds = array<i64: 1, 192>}, {transform_indices = @transform_3, window_bounds = array<i64: 2, 128, 64>}]} {
    %c0 = arith.constant 0 : index
    %c0_0 = arith.constant 0 : index
    %c0_1 = arith.constant 0 : index
    %0 = vector.load %arg1[%c0, %c0_0, %c0_1] : memref<2x128x384xbf16, #tpu.memory_space<vmem>>, vector<2x128x384xbf16>
    %1 = vector.shape_cast %0 : vector<2x128x384xbf16> to vector<256x384xbf16>
    %c0_2 = arith.constant 0 : index
    %c0_3 = arith.constant 0 : index
    %2 = vector.load %arg2[%c0_2, %c0_3] : memref<384x192xbf16, #tpu.memory_space<vmem>>, vector<384x192xbf16>
    %cst = arith.constant dense<0.000000e+00> : vector<256x192xf32>
    %3 = tpu.matmul %1, %2, %cst {dimension_numbers = #tpu.dot_dimension_numbers<[1], [0], [0], [1], [0, 0, 1, 1], [], []>} : vector<256x384xbf16>, vector<384x192xbf16>, vector<256x192xf32> -> vector<256x192xf32>
    %c0_4 = arith.constant 0 : index
    %c0_5 = arith.constant 0 : index
    %4 = vector.load %arg3[%c0_4, %c0_5] : memref<1x192xf32, #tpu.memory_space<vmem>>, vector<1x192xf32>
    %5 = vector.broadcast %4 : vector<1x192xf32> to vector<256x192xf32>
    %6 = arith.addf %3, %5 : vector<256x192xf32>
    %7 = vector.shape_cast %6 : vector<256x192xf32> to vector<2x128x192xf32>
    %8 = vector.extract_strided_slice %7 {offsets = [0, 0, 0], sizes = [2, 128, 64], strides = [1, 1, 1]} : vector<2x128x192xf32> to vector<2x128x64xf32>
    %9 = arith.truncf %8 : vector<2x128x64xf32> to vector<2x128x64xbf16>
    %10 = vector.extract_strided_slice %7 {offsets = [0, 0, 64], sizes = [2, 128, 64], strides = [1, 1, 1]} : vector<2x128x192xf32> to vector<2x128x64xf32>
    %11 = arith.truncf %10 : vector<2x128x64xf32> to vector<2x128x64xbf16>
    %12 = vector.extract_strided_slice %7 {offsets = [0, 0, 128], sizes = [2, 128, 64], strides = [1, 1, 1]} : vector<2x128x192xf32> to vector<2x128x64xf32>
    %13 = arith.truncf %12 : vector<2x128x64xf32> to vector<2x128x64xbf16>
    "tpu.trace_start"() <{level = 10 : i32, message = "bqd,bkd->bqk"}> : () -> ()
    %cst_6 = arith.constant dense<0.000000e+00> : vector<2x128x128xf32>
    %14 = tpu.matmul %9, %11, %cst_6 {dimension_numbers = #tpu.dot_dimension_numbers<[2], [2], [1], [1], [0, 0, 0, 1, 1, 1], [0], [0]>} : vector<2x128x64xbf16>, vector<2x128x64xbf16>, vector<2x128x128xf32> -> vector<2x128x128xf32>
    "tpu.trace_stop"() : () -> ()
    %15 = tpu.iota {dimensions = array<i32: 1>} : vector<1x128x1xi32>
    %16 = tpu.iota {dimensions = array<i32: 2>} : vector<1x1x128xi32>
    %17 = vector.broadcast %15 : vector<1x128x1xi32> to vector<1x128x128xi32>
    %18 = vector.broadcast %16 : vector<1x1x128xi32> to vector<1x128x128xi32>
    %19 = arith.cmpi sge, %17, %18 : vector<1x128x128xi32>
    %cst_7 = arith.constant 0xFF800000 : f32
    %20 = vector.shape_cast %19 : vector<1x128x128xi1> to vector<1x128x128xi1>
    %21 = vector.broadcast %20 : vector<1x128x128xi1> to vector<2x128x128xi1>
    %22 = vector.broadcast %cst_7 : f32 to vector<2x128x128xf32>
    %23 = arith.select %21, %14, %22 : vector<2x128x128xi1>, vector<2x128x128xf32>
    %cst_8 = arith.constant dense<0xFF800000> : vector<2x128xf32>
    %24 = vector.multi_reduction <maximumf>, %23, %cst_8 [2] : vector<2x128x128xf32> to vector<2x128xf32>
    %25 = vector.shape_cast %24 : vector<2x128xf32> to vector<2x128x1xf32>
    %26 = vector.broadcast %25 : vector<2x128x1xf32> to vector<2x128x128xf32>
    %27 = arith.subf %23, %26 : vector<2x128x128xf32>
    %28 = math.exp %27 : vector<2x128x128xf32>
    %cst_9 = arith.constant dense<0.000000e+00> : vector<2x128xf32>
    %29 = vector.multi_reduction <add>, %28, %cst_9 [2] : vector<2x128x128xf32> to vector<2x128xf32>
    %30 = vector.shape_cast %29 : vector<2x128xf32> to vector<2x128x1xf32>
    %31 = arith.truncf %28 : vector<2x128x128xf32> to vector<2x128x128xbf16>
    "tpu.trace_start"() <{level = 10 : i32, message = "bqk,bkd->bqd"}> : () -> ()
    %cst_10 = arith.constant dense<0.000000e+00> : vector<2x128x64xf32>
    %32 = tpu.matmul %31, %13, %cst_10 {dimension_numbers = #tpu.dot_dimension_numbers<[2], [1], [1], [2], [0, 0, 0, 1, 1, 2], [0], [0]>} : vector<2x128x128xbf16>, vector<2x128x64xbf16>, vector<2x128x64xf32> -> vector<2x128x64xf32>
    "tpu.trace_stop"() : () -> ()
    %33 = tpu.reciprocal %30 {approx = true} : vector<2x128x1xf32> -> vector<2x128x1xf32>
    %34 = vector.broadcast %33 : vector<2x128x1xf32> to vector<2x128x64xf32>
    %35 = arith.mulf %32, %34 : vector<2x128x64xf32>
    %c0_11 = arith.constant 0 : index
    %c0_12 = arith.constant 0 : index
    %c0_13 = arith.constant 0 : index
    %36 = vector.load %arg4[%c0_11, %c0_12, %c0_13] : memref<2x128x64xf32, #tpu.memory_space<vmem>>, vector<2x128x64xf32>
    tpu.vector_store %arg4[%c0_11, %c0_12, %c0_13], %35 {strides = array<i32>} : memref<2x128x64xf32, #tpu.memory_space<vmem>>, vector<2x128x64xf32>,
    return
  }
  func.func @transform_0(%arg0: i32) -> (i32, i32, i32) {
    %c0_i32 = arith.constant 0 : i32
    %c0_i32_0 = arith.constant 0 : i32
    %c0_i32_1 = arith.constant 0 : i32
    return %arg0, %c0_i32, %c0_i32_0 : i32, i32, i32
  }
  func.func @transform_1(%arg0: i32) -> (i32, i32) {
    %c0_i32 = arith.constant 0 : i32
    %c0_i32_0 = arith.constant 0 : i32
    %c0_i32_1 = arith.constant 0 : i32
    return %c0_i32, %c0_i32_0 : i32, i32
  }
  func.func @transform_2(%arg0: i32) -> (i32, i32) {
    %c0_i32 = arith.constant 0 : i32
    %c0_i32_0 = arith.constant 0 : i32
    %c0_i32_1 = arith.constant 0 : i32
    return %c0_i32, %c0_i32_0 : i32, i32
  }
  func.func @transform_3(%arg0: i32) -> (i32, i32, i32) {
    %c0_i32 = arith.constant 0 : i32
    %c0_i32_0 = arith.constant 0 : i32
    %c0_i32_1 = arith.constant 0 : i32
    return %arg0, %c0_i32, %c0_i32_0 : i32, i32, i32
  }
}

</mosaic_0001>

<bundles_post_ra>
// kernel: tpu_custom_call.1
= control target key start
LH: loop header
LB: loop body
LE: loop exit
PB: predicated region body
PF: predicated region fallthrough
CT: control target
= control target key end

     0   :  { %8 = vsyncpa [#allocation3], 0  ;;  %s4228_s0 = inlined_call_operand.hbm [shape: bf16[4,128,384], index: 0, kind: input, shape index: {}]   ;;  %s4229_s1 = inlined_call_operand.vmem [shape: bf16[384,192], index: 1, kind: input, shape index: {}]   ;;  %s4230_s2 = inlined_call_operand.vmem [shape: f32[1,192], index: 2, kind: input, shape index: {}]   ;;  %s4231_s3 = inlined_call_operand.vmem [shape: f32[4,128,64], index: 3, kind: output, shape index: {}]  }
   0x1   :  { %10 = vsyncpa [#allocation3 + $0x1], 0  ;;  %s3151_s12 = smov 0   ;;  %s3153_s13 = smov 0  }
   0x2   :  { %s3155_s14 = smov 0   ;;  %s3157_s15 = smov 0  }
   0x3 LB: > { %s2272_s16 = sadd.s32 4294967295, %s3124_s15   ;;  %s3171_s17 = sadd.s32 1, %s3124_s15   ;;  %s3124_s15 = sphi %s3157_s15, %s4270_s15   ;;  %s3120_s14 = sphi %s3155_s14, %s4269_s14   ;;  %s3116_s13 = sphi %s3153_s13, %s4268_s13   ;;  %s3112_s12 = sphi %s3151_s12, %s4267_s12  }
   0x4   : > { %s20_s18 = ssub.s32 %s3124_s15, %s3171_s17  ;;  %s23_s19 = sadd.s32 1, %s3120_s14 }
   0x5   : > { %p21_p0 = scmp.eq.s32.totalorder %s20_s18, 0  ;;  %p30_p1 = scmp.ne.s32.totalorder %s3120_s14, %s3116_s13 }
   0x6   : > { %p31_p2 = scmp.eq.s32.totalorder %s3124_s15, 0  ;;  %p36_p3 = scmp.ne.s32.totalorder %s3116_s13, %s3112_s12 }
   0x7   : > { %s3181_s20 = scalar_select %p21_p0, %s3120_s14, %s23_s19  }
   0x8   : > { %p32_p4 = por %p31_p2, %p30_p1  ;;  %p37_p5 = scmp.eq.s32.totalorder %s2272_s16, 0 }
   0x9   : > { %p2759_p6 = scmp.lt.s32.totalorder %s3124_s15, 2  ;;  %s134_s22 = sand.u32 1, %s3120_s14  }
   0xa   : > { %p3186_p7 = por %p37_p5, %p36_p3  ;;  %s2750_s23 = smul.u32 384, %s134_s22 }
   0xb   : > { %s2751_s24 = smul.u32 6144, %s3124_s15  ;;  %p3192_p8 = pnand %p2759_p6, %p32_p4 }
   0xc   : > { %s138_s29 = scalar_lea.vmem [#allocation2], %s2750_s23  ;;  %s3204_s4 = scalar_lea.sflag [#allocation3], %s134_s22 }
   0xd   : > { %s3199_s28 = scalar_lea.hbm %s4228_s0, %s2751_s24  ;;  %s146_s30 = sshll.u32 %s138_s29, 4  ;;  %s3201_s30 = int_to_ptr.vmem [resolvable:$true] %s146_s30 }
   0xe   : > { %s3060_s5 = scalar_lea.hbm %s3199_s28, 6144  ;;  %p3062_p11 = pneg %p3192_p8 }
   0xf   : > { %p3061_p10 = scmp.ne.s32.totalorder %s3199_s28, %s3060_s5  ;;  %s3065_s8 = scalar_lea.hbm %s4228_s0, 12288 }
  0x10   : > { %p3066_p0 = scmp.lt.u32.totalorder %s3199_s28, %s4228_s0  ;;  %p3067_p1 = scmp.lt.u32.totalorder %s3065_s8, %s3060_s5 }
  0x11   : > { %p3063_p12 = pnand %p3062_p11, %p3061_p10  ;;  %p3069_p3 = scmp.lt.u32.totalorder %s3060_s5, %s3199_s28 }
  0x12   : > { %p3068_p2 = por %p3067_p1, %p3066_p0 }
  0x13   : > { %p3064_p13 = pneg %p3063_p12 }
  0x14   : > { %p3070_p4 = por %p3069_p3, %p3068_p2 }
  0x16   : > { %p3071_p5 = pnand %p3070_p4, %p3064_p13 }
  0x18   : > { %3074 = shalt.err (!%p3071_p5)
}
  0x19   : > { %s3075_s11 = scalar_lea.vmem %s3201_s30, 6144  ;;  %s3126_s12 = smov [#allocation2]  }
  0x1a   : > { %p3076_p6 = scmp.ne.s32.totalorder %s3201_s30, %s3075_s11  ;;  %s3080_s18 = sshll.u32 %s3126_s12, 4  ;;  %s3081_s18 = int_to_ptr.vmem [resolvable:$false] %s3080_s18 }
  0x1b   : > { %s3082_s19 = scalar_lea.vmem %s3081_s18, 12288  ;;  %p3083_p9 = scmp.lt.s32.totalorder %s3201_s30, %s3081_s18 }
  0x1c   : > { %p3078_p10 = pnand %p3076_p6, %p3062_p11  ;;  %p3084_p0 = scmp.lt.s32.totalorder %s3082_s19, %s3075_s11 }
  0x1e   : > { %p3079_p12 = pneg %p3078_p10  ;;  %p3085_p1 = por %p3084_p0, %p3083_p9 }
  0x20   : > { %p3086_p2 = pnand %p3085_p1, %p3079_p12 }
  0x22   : > { %3089 = shalt.err (!%p3086_p2)
}
  0x23   : > { %s3127_s22 = smov 192   ;;  %s3128_s23 = smov 12  }
  0x24   : > { %2758 = dma.hbm_to_vmem [thread:$0]  (!%p3192_p8), %s3199_s28, 6144, %s3201_s30, %s3204_s4, %s3127_s22, %s3127_s22, %s3128_s23  }
  0x25   : > { %p154_p11 = scmp.lt.s32.totalorder %s3124_s15, 3  ;;  %p4235_p13 = scmp.ge.s32.totalorder %s3124_s15, 1 }
  0x27   : > { %p155_p3 = pnand %p4235_p13, %p154_p11 }
  0x28   : > { %s160_s24 = sand.u32 (!%p155_p3), 1, %s3116_s13  }
  0x29   : > { %158 = sbr.rel (%p155_p3) target bundleno = 1324 (0x52c), region = 32  ;;  %s161_s27 = scalar_lea.sflag (!%p155_p3), [#allocation3], %s160_s24 }
  0x2a   : > { %s2752_s26 = smul.u32 (!%p155_p3), 384, %s160_s24 }
  0x2c   : > { %s3236_s29 = scalar_lea.vmem (!%p155_p3), [#allocation2], %s2752_s26 }
  0x30   : > { %3107 = dma.done.wait (%p3186_p7), %s161_s27, 6144  }
  0x31   : > { %3109 = vsyncadd (%p3186_p7), %s161_s27, 4294961152  ;;  %v2796_v0 = vld [vmem:[%s4229_s1 + $0x4] ss:$8 sps:$4 sm:$0xff]   ;;  %v2798_v1 = vld [vmem:[%s4229_s1] ss:$8 sps:$4 sm:$0xff]   ;;  %v3129_v4 = vmov 0  }
  0x32   : > { %817 = vmatprep.subr.bf16.mxu0 %v2796_v0  ;;  %v2799_v2 = vld [vmem:[%s4229_s1 + $0x14] ss:$8 sps:$4 sm:$0xff]   ;;  %v2801_v3 = vld [vmem:[%s4229_s1 + $0x10] ss:$8 sps:$4 sm:$0xff]   ;;  %1122 = vmatprep.mubr.bf16.mxu1 %v3129_v4  ;;  %v2802_v5 = vld [vmem:[%s4229_s1 + $0x24] ss:$8 sps:$4 sm:$0xff]  }
  0x33   : > { %818 = vmatpush1.bf16.msra.mxu0 %v2798_v1  ;;  %v2804_v6 = vld [vmem:[%s4229_s1 + $0x20] ss:$8 sps:$4 sm:$0xff]   ;;  %v2805_v7 = vld [vmem:[%s4229_s1 + $0x34] ss:$8 sps:$4 sm:$0xff]   ;;  %v2807_v8 = vld [vmem:[%s4229_s1 + $0x30] ss:$8 sps:$4 sm:$0xff]  }
  0x34   : > { %819 = vmatprep.subr.bf16.mxu0 %v2799_v2  ;;  %v2808_v9 = vld [vmem:[%s4229_s1 + $0x44] ss:$8 sps:$4 sm:$0xff]   ;;  %v2810_v10 = vld [vmem:[%s4229_s1 + $0x40] ss:$8 sps:$4 sm:$0xff]   ;;  %v2811_v11 = vld [vmem:[%s4229_s1 + $0x54] ss:$8 sps:$4 sm:$0xff]  }
  0x35   : > { %v2813_v12 = vld [vmem:[%s4229_s1 + $0x50] ss:$8 sps:$4 sm:$0xff]   ;;  %v2814_v13 = vld [vmem:[%s4229_s1 + $0x64] ss:$8 sps:$4 sm:$0xff]   ;;  %v2816_v14 = vld [vmem:[%s4229_s1 + $0x60] ss:$8 sps:$4 sm:$0xff]  }
  0x36   : > { %v2846_v15 = vld [vmem:[%s3236_s29 + $0x4] ss:$12 sps:$4 sm:$0xff]   ;;  %v3289_v16 = vld [vmem:[%s4229_s1 + $0x100] ss:$8 sps:$4 sm:$0xff]   ;;  %v2817_v18 = vld [vmem:[%s4229_s1 + $0x74] ss:$8 sps:$4 sm:$0xff]  }
  0x37   : > { %820 = vmatpush1.bf16.msra.mxu0 %v2801_v3  ;;  %v3294_v17 = vld [vmem:[%s4229_s1 + $0x104] ss:$8 sps:$4 sm:$0xff]   ;;  %849 = vmatprep.mubr.bf16.mxu0 %v2846_v15  ;;  %v2819_v19 = vld [vmem:[%s4229_s1 + $0x70] ss:$8 sps:$4 sm:$0xff]   ;;  %v3312_v21 = vld [vmem:[%s4229_s1 + $0x114] ss:$8 sps:$4 sm:$0xff]  }
  0x38   : > { %821 = vmatprep.subr.bf16.mxu0 %v2802_v5  ;;  %2590 = vmatprep.subr.bf16.mxu1 %v3294_v17  ;;  %v3307_v20 = vld [vmem:[%s4229_s1 + $0x110] ss:$8 sps:$4 sm:$0xff]   ;;  %v2820_v22 = vld [vmem:[%s4229_s1 + $0x84] ss:$8 sps:$4 sm:$0xff]   ;;  %v2822_v23 = vld [vmem:[%s4229_s1 + $0x80] ss:$8 sps:$4 sm:$0xff]  }
  0x39   : > { %2598 = vmatpush1.bf16.msra.mxu1 %v3289_v16  ;;  %v3325_v24 = vld [vmem:[%s4229_s1 + $0x120] ss:$8 sps:$4 sm:$0xff]   ;;  %v3330_v25 = vld [vmem:[%s4229_s1 + $0x124] ss:$8 sps:$4 sm:$0xff]   ;;  %v2823_v26 = vld [vmem:[%s4229_s1 + $0x94] ss:$8 sps:$4 sm:$0xff]  }
  0x3a   : > { %2591 = vmatprep.subr.bf16.mxu1 %v3312_v21  ;;  %v3340_v27 = vld [vmem:[%s4229_s1 + $0x134] ss:$8 sps:$4 sm:$0xff]   ;;  %v2825_v28 = vld [vmem:[%s4229_s1 + $0x90] ss:$8 sps:$4 sm:$0xff]   ;;  %v2826_v29 = vld [vmem:[%s4229_s1 + $0xa4] ss:$8 sps:$4 sm:$0xff]  }
  0x3b   : > { %822 = vmatpush1.bf16.msra.mxu0 %v2804_v6  ;;  %v3351_v30 = vld [vmem:[%s4229_s1 + $0x130] ss:$8 sps:$4 sm:$0xff]   ;;  %v3357_v31 = vld [vmem:[%s4229_s1 + $0x144] ss:$8 sps:$4 sm:$0xff]   ;;  %v3363_v32 = vld [vmem:[%s4229_s1 + $0x140] ss:$8 sps:$4 sm:$0xff]  }
  0x3c   : > { %823 = vmatprep.subr.bf16.mxu0 %v2805_v7  ;;  %v2828_v33 = vld [vmem:[%s4229_s1 + $0xa0] ss:$8 sps:$4 sm:$0xff]   ;;  %v3372_v34 = vld [vmem:[%s4229_s1 + $0x154] ss:$8 sps:$4 sm:$0xff]   ;;  %v3381_v36 = vld [vmem:[%s4229_s1 + $0x150] ss:$8 sps:$4 sm:$0xff]  }
  0x3d   : > { %2599 = vmatpush1.bf16.msra.mxu1 %v3307_v20  ;;  %v2829_v35 = vld [vmem:[%s4229_s1 + $0xb4] ss:$8 sps:$4 sm:$0xff]   ;;  %v2831_v37 = vld [vmem:[%s4229_s1 + $0xb0] ss:$8 sps:$4 sm:$0xff]   ;;  %v3390_v38 = vld [vmem:[%s4229_s1 + $0x164] ss:$8 sps:$4 sm:$0xff]  }
  0x3e   : > { %2592 = vmatprep.subr.bf16.mxu1 %v3330_v25  ;;  %v2832_v39 = vld [vmem:[%s4229_s1 + $0xc4] ss:$8 sps:$4 sm:$0xff]   ;;  %v2834_v40 = vld [vmem:[%s4229_s1 + $0xc0] ss:$8 sps:$4 sm:$0xff]   ;;  %v3408_v42 = vld [vmem:[%s4229_s1 + $0x174] ss:$8 sps:$4 sm:$0xff]  }
  0x3f   : > { %824 = vmatpush1.bf16.msra.mxu0 %v2807_v8  ;;  %v3402_v41 = vld [vmem:[%s4229_s1 + $0x160] ss:$8 sps:$4 sm:$0xff]   ;;  %v2835_v43 = vld [vmem:[%s4229_s1 + $0xd4] ss:$8 sps:$4 sm:$0xff]   ;;  %v3417_v44 = vld [vmem:[%s4229_s1 + $0x170] ss:$8 sps:$4 sm:$0xff]  }
  0x40   : > { %825 = vmatprep.subr.bf16.mxu0 %v2808_v9  ;;  %v2837_v45 = vld [vmem:[%s4229_s1 + $0xd0] ss:$8 sps:$4 sm:$0xff]   ;;  %v2838_v46 = vld [vmem:[%s4229_s1 + $0xe4] ss:$8 sps:$4 sm:$0xff]   ;;  %v2895_v47 = vld [vmem:[%s3236_s29 + $0xc8] ss:$12 sps:$4 sm:$0xff]  }
  0x41   : > { %2600 = vmatpush1.bf16.msra.mxu1 %v3325_v24  ;;  %v2840_v48 = vld [vmem:[%s4229_s1 + $0xe0] ss:$8 sps:$4 sm:$0xff]   ;;  %v2841_v49 = vld [vmem:[%s4229_s1 + $0xf4] ss:$8 sps:$4 sm:$0xff]   ;;  %v2843_v50 = vld [vmem:[%s4229_s1 + $0xf0] ss:$8 sps:$4 sm:$0xff]  }
  0x42   : > { %2593 = vmatprep.subr.bf16.mxu1 %v3340_v27  ;;  %v2844_v51 = vld [vmem:[%s3236_s29] ss:$12 sps:$4 sm:$0xff]   ;;  %v2850_v53 = vld [vmem:[%s3236_s29 + $0x1c] ss:$12 sps:$4 sm:$0xff]   ;;  %v2903_v54 = vld [vmem:[%s3236_s29 + $0xf8] ss:$12 sps:$4 sm:$0xff]  }
  0x43   : > { %826 = vmatpush1.bf16.msra.mxu0 %v2810_v10  ;;  %v2899_v52 = vld [vmem:[%s3236_s29 + $0xe0] ss:$12 sps:$4 sm:$0xff]   ;;  %v2852_v55 = vld [vmem:[%s3236_s29 + $0x18] ss:$12 sps:$4 sm:$0xff]   ;;  %v2907_v57 = vld [vmem:[%s3236_s29 + $0x110] ss:$12 sps:$4 sm:$0xff]  }
  0x44   : > { %827 = vmatprep.subr.bf16.mxu0 %v2811_v11  ;;  %v2853_v56 = vld [vmem:[%s3236_s29 + $0x34] ss:$12 sps:$4 sm:$0xff]   ;;  %v2855_v58 = vld [vmem:[%s3236_s29 + $0x30] ss:$12 sps:$4 sm:$0xff]   ;;  %v2859_v59 = vld [vmem:[%s3236_s29 + $0x4c] ss:$12 sps:$4 sm:$0xff]  }
  0x45   : > { %2601 = vmatpush1.bf16.msra.mxu1 %v3351_v30  ;;  %v2911_v60 = vld [vmem:[%s3236_s29 + $0x128] ss:$12 sps:$4 sm:$0xff]   ;;  %v2862_v62 = vld [vmem:[%s3236_s29 + $0x64] ss:$12 sps:$4 sm:$0xff]   ;;  %v2915_v63 = vld [vmem:[%s3236_s29 + $0x140] ss:$12 sps:$4 sm:$0xff]  }
  0x46   : > { %2594 = vmatprep.subr.bf16.mxu1 %v3357_v31  ;;  %v2861_v61 = vld [vmem:[%s3236_s29 + $0x48] ss:$12 sps:$4 sm:$0xff]   ;;  %v2864_v0 = vld [vmem:[%s3236_s29 + $0x60] ss:$12 sps:$4 sm:$0xff]   ;;  %v2919_v2 = vld [vmem:[%s3236_s29 + $0x158] ss:$12 sps:$4 sm:$0xff]  }
  0x47   : > { %828 = vmatpush1.bf16.msra.mxu0 %v2813_v12  ;;  %v2868_v1 = vld [vmem:[%s3236_s29 + $0x7c] ss:$12 sps:$4 sm:$0xff]   ;;  %v2870_v3 = vld [vmem:[%s3236_s29 + $0x78] ss:$12 sps:$4 sm:$0xff]   ;;  %v2873_v5 = vld [vmem:[%s3236_s29 + $0x94] ss:$12 sps:$4 sm:$0xff]  }
  0x48   : > { %829 = vmatprep.subr.bf16.mxu0 %v2814_v13  ;;  %v2923_v6 = vld [vmem:[%s3236_s29 + $0x170] ss:$12 sps:$4 sm:$0xff]   ;;  %v2882_v8 = vld [vmem:[%s3236_s29 + $0xac] ss:$12 sps:$4 sm:$0xff]   ;;  %v2885_v9 = vld [vmem:[%s3236_s29 + $0xa8] ss:$12 sps:$4 sm:$0xff]  }
  0x49   : > { %2602 = vmatpush1.bf16.msra.mxu1 %v3363_v32  ;;  %v2876_v7 = vld [vmem:[%s3236_s29 + $0x90] ss:$12 sps:$4 sm:$0xff]   ;;  %v2894_v11 = vld [vmem:[%s3236_s29 + $0xc0] ss:$12 sps:$4 sm:$0xff]   ;;  %v2898_v13 = vld [vmem:[%s3236_s29 + $0xd8] ss:$12 sps:$4 sm:$0xff]  }
  0x4a   : > { %2595 = vmatprep.subr.bf16.mxu1 %v3372_v34  ;;  %v2891_v10 = vld [vmem:[%s3236_s29 + $0xc4] ss:$12 sps:$4 sm:$0xff]   ;;  %v2896_v12 = vld [vmem:[%s3236_s29 + $0xdc] ss:$12 sps:$4 sm:$0xff]   ;;  %vm4232_vm0 = vcmask 523264   ;;  %s3130_s24 = smov 64  }
  0x4b   : > { %830 = vmatpush1.bf16.msra.mxu0 %v2816_v14  ;;  %v2900_v14 = vld [vmem:[%s3236_s29 + $0xf4] ss:$12 sps:$4 sm:$0xff]   ;;  %v2902_v15 = vld [vmem:[%s3236_s29 + $0xf0] ss:$12 sps:$4 sm:$0xff]   ;;  %s2280_s26 = sshll.u32 %s2272_s16, 1 }
  0x4c   : > { %831 = vmatprep.subr.bf16.mxu0 %v2817_v18  ;;  %v2908_v18 = vld [vmem:[%s3236_s29 + $0x124] ss:$12 sps:$4 sm:$0xff]   ;;  %p190_p7 = scmp.lt.s32.totalorder %s2280_s26, 3 }
  0x4d   : > { %2603 = vmatpush1.bf16.msra.mxu1 %v3381_v36 }
  0x4e   : > { %2596 = vmatprep.subr.bf16.mxu1 %v3390_v38  ;;  %s4272_s26 = smov (!%p190_p7, %s2280_s26), 3 }
  0x4f   : > { %832 = vmatpush1.bf16.msra.mxu0 %v2819_v19  ;;  %v2910_v19 = vld [vmem:[%s3236_s29 + $0x120] ss:$12 sps:$4 sm:$0xff]   ;;  %s2397_s27 = sshll.u32 %s4272_s26, 7 }
  0x50   : > { %833 = vmatprep.subr.bf16.mxu0 %v2820_v22  ;;  %v2916_v22 = vld [vmem:[%s3236_s29 + $0x154] ss:$12 sps:$4 sm:$0xff]   ;;  %s4149_s15 = scalar_lea.vmem %s4231_s3, %s2397_s27 }
  0x51   : > { %2604 = vmatpush1.bf16.msra.mxu1 %v3402_v41 }
  0x52   : > { %2597 = vmatprep.subr.bf16.mxu1 %v3408_v42 }
  0x53   : > { %834 = vmatpush1.bf16.msra.mxu0 %v2822_v23  ;;  %v2918_v23 = vld [vmem:[%s3236_s29 + $0x150] ss:$12 sps:$4 sm:$0xff]  }
  0x54   : > { %835 = vmatprep.subr.bf16.mxu0 %v2823_v26  ;;  %v2924_v26 = vld [vmem:[%s3236_s29 + $0x8] ss:$12 sps:$4 sm:$0xff]  }
  0x55   : > { %2605 = vmatpush1.bf16.msra.mxu1 %v3417_v44 }
  0x57   : > { %836 = vmatpush1.bf16.msra.mxu0 %v2825_v28  ;;  %v2926_v28 = vld [vmem:[%s3236_s29 + $0x38] ss:$12 sps:$4 sm:$0xff]  }
  0x58   : > { %837 = vmatprep.subr.bf16.mxu0 %v2826_v29  ;;  %1123 = vmatmul.mubr.bf16.vlgmr.msra.gmra.mrb[0].mxu1 %v2895_v47  ;;  %v2927_v29 = vld [vmem:[%s3236_s29 + $0x50] ss:$12 sps:$4 sm:$0xff]  }
  0x59   : > { %1132 = vmatprep.mubr.bf16.mxu1 %v3129_v4 }
  0x5b   : > { %838 = vmatpush1.bf16.msra.mxu0 %v2828_v33  ;;  %v2931_v33 = vld [vmem:[%s3236_s29 + $0xb0] ss:$12 sps:$4 sm:$0xff]  }
  0x5c   : > { %839 = vmatprep.subr.bf16.mxu0 %v2829_v35 }
  0x5f   : > { %840 = vmatpush1.bf16.msra.mxu0 %v2831_v37 }
  0x60   : > { %841 = vmatprep.subr.bf16.mxu0 %v2832_v39  ;;  %1133 = vmatmul.mubr.bf16.gmra.mrb[4].mxu1 %v2899_v52 }
  0x61   : > { %1142 = vmatprep.mubr.bf16.mxu1 %v3129_v4 }
  0x63   : > { %842 = vmatpush1.bf16.msra.mxu0 %v2834_v40 }
  0x64   : > { %843 = vmatprep.subr.bf16.mxu0 %v2835_v43 }
  0x67   : > { %844 = vmatpush1.bf16.msra.mxu0 %v2837_v45 }
  0x68   : > { %845 = vmatprep.subr.bf16.mxu0 %v2838_v46  ;;  %1143 = vmatmul.mubr.bf16.gmra.mrb[8].mxu1 %v2903_v54 }
  0x69   : > { %1152 = vmatprep.mubr.bf16.mxu1 %v3129_v4 }
  0x6b   : > { %846 = vmatpush1.bf16.msra.mxu0 %v2840_v48 }
  0x6c   : > { %847 = vmatprep.subr.bf16.mxu0 %v2841_v49 }
  0x6f   : > { %848 = vmatpush1.bf16.msra.mxu0 %v2843_v50 }
  0x70   : > { %1010 = vmatprep.subr.bf16.mxu0 %v3294_v17  ;;  %1153 = vmatmul.mubr.bf16.gmra.mrb[12].mxu1 %v2907_v57  ;;  %v2906_v17 = vld [vmem:[%s3236_s29 + $0x108] ss:$12 sps:$4 sm:$0xff]  }
  0x71   : > { %1162 = vmatprep.mubr.bf16.mxu1 %v3129_v4 }
  0x72   : > { %850 = vmatmul.mubr.bf16.vlgmr.msra.gmra.mrb[0].mxu0 %v2844_v51 }
  0x73   : > { %1011 = vmatpush1.bf16.msra.mxu0 %v3289_v16  ;;  %859 = vmatprep.mubr.bf16.mxu0 %v2850_v53  ;;  %v2904_v16 = vld [vmem:[%s3236_s29 + $0x10c] ss:$12 sps:$4 sm:$0xff]  }
  0x74   : > { %1012 = vmatprep.subr.bf16.mxu0 %v3312_v21  ;;  %v2914_v21 = vld [vmem:[%s3236_s29 + $0x138] ss:$12 sps:$4 sm:$0xff]  }
  0x77   : > { %1013 = vmatpush1.bf16.msra.mxu0 %v3307_v20  ;;  %v2912_v20 = vld [vmem:[%s3236_s29 + $0x13c] ss:$12 sps:$4 sm:$0xff]  }
  0x78   : > { %1014 = vmatprep.subr.bf16.mxu0 %v3330_v25  ;;  %1163 = vmatmul.mubr.bf16.gmra.mrb[16].mxu1 %v2911_v60  ;;  %v2922_v25 = vld [vmem:[%s3236_s29 + $0x168] ss:$12 sps:$4 sm:$0xff]  }
  0x79   : > { %1172 = vmatprep.mubr.bf16.mxu1 %v3129_v4 }
  0x7a   : > { %860 = vmatmul.mubr.bf16.gmra.mrb[4].mxu0 %v2852_v55 }
  0x7b   : > { %869 = vmatprep.mubr.bf16.mxu0 %v2853_v56  ;;  %1015 = vmatpush1.bf16.msra.mxu0 %v3325_v24  ;;  %v2920_v24 = vld [vmem:[%s3236_s29 + $0x16c] ss:$12 sps:$4 sm:$0xff]  }
  0x7c   : > { %1016 = vmatprep.subr.bf16.mxu0 %v3340_v27  ;;  %v2925_v27 = vld [vmem:[%s3236_s29 + $0x20] ss:$12 sps:$4 sm:$0xff]  }
  0x7f   : > { %1017 = vmatpush1.bf16.msra.mxu0 %v3351_v30  ;;  %v2928_v30 = vld [vmem:[%s3236_s29 + $0x68] ss:$12 sps:$4 sm:$0xff]  }
  0x80   : > { %1018 = vmatprep.subr.bf16.mxu0 %v3357_v31  ;;  %1173 = vmatmul.mubr.bf16.gmra.mrb[20].mxu1 %v2915_v63  ;;  %v2929_v31 = vld [vmem:[%s3236_s29 + $0x80] ss:$12 sps:$4 sm:$0xff]   ;;  %v311_v63 = vlaneseq }
  0x81   : > { %1182 = vmatprep.mubr.bf16.mxu1 %v3129_v4 }
  0x82   : > { %870 = vmatmul.mubr.bf16.gmra.mrb[8].mxu0 %v2855_v58 }
  0x83   : > { %879 = vmatprep.mubr.bf16.mxu0 %v2859_v59  ;;  %1019 = vmatpush1.bf16.msra.mxu0 %v3363_v32  ;;  %v2930_v32 = vld [vmem:[%s3236_s29 + $0x98] ss:$12 sps:$4 sm:$0xff]  }
  0x84   : > { %1020 = vmatprep.subr.bf16.mxu0 %v3372_v34 }
  0x87   : > { %1021 = vmatpush1.bf16.msra.mxu0 %v3381_v36 }
  0x88   : > { %1022 = vmatprep.subr.bf16.mxu0 %v3390_v38  ;;  %1183 = vmatmul.mubr.bf16.gmra.mrb[24].mxu1 %v2919_v2  ;;  %v3563_v2 = vshrl.u32 %v311_v63, 7 }
  0x89   : > { %1192 = vmatprep.mubr.bf16.mxu1 %v3129_v4 }
  0x8a   : > { %880 = vmatmul.mubr.bf16.gmra.mrb[12].mxu0 %v2861_v61 }
  0x8b   : > { %889 = vmatprep.mubr.bf16.mxu0 %v2862_v62  ;;  %1023 = vmatpush1.bf16.msra.mxu0 %v3402_v41 }
  0x8c   : > { %1024 = vmatprep.subr.bf16.mxu0 %v3408_v42 }
  0x8f   : > { %1025 = vmatpush1.bf16.msra.mxu0 %v3417_v44 }
  0x90   : > { %1193 = vmatmul.mubr.bf16.gmra.mrb[28].mxu1 %v2923_v6  ;;  %v317_v6 = vsub.s32 1, %v3563_v2 }
  0x92   : > { %890 = vmatmul.mubr.bf16.gmra.mrb[16].mxu0 %v2864_v0 }
  0x93   : > { %899 = vmatprep.mubr.bf16.mxu0 %v2868_v1 }
  0x9a   : > { %900 = vmatmul.mubr.bf16.gmra.mrb[20].mxu0 %v2870_v3  ;;  %v313_v3 = vsub.s32 0, %v3563_v2 }
  0x9b   : > { %909 = vmatprep.mubr.bf16.mxu0 %v2873_v5  ;;  %v309_v5 = vld [vmem:[%s4230_s2] sm:$0x3] }
  0xa2   : > { %910 = vmatmul.mubr.bf16.gmra.mrb[24].mxu0 %v2876_v7  ;;  %v3570_v7 = vrot.slane %v309_v5, %v313_v3 }
  0xa3   : > { %919 = vmatprep.mubr.bf16.mxu0 %v2882_v8  ;;  %v3572_v8 = vrot.slane %v309_v5, %v317_v6 }
  0xaa   : > { %920 = vmatmul.mubr.bf16.gmra.mrb[28].mxu0 %v2885_v9 }
  0xab   : > { %929 = vmatprep.mubr.bf16.mxu0 %v2891_v10 }
  0xb2   : > { %930 = vmatmul.mubr.bf16.gmra.mrb[32].mxu0 %v2894_v11 }
  0xb3   : > { %939 = vmatprep.mubr.bf16.mxu0 %v2896_v12 }
  0xba   : > { %940 = vmatmul.mubr.bf16.gmra.mrb[36].mxu0 %v2898_v13 }
  0xbb   : > { %949 = vmatprep.mubr.bf16.mxu0 %v2900_v14 }
  0xc2   : > { %950 = vmatmul.mubr.bf16.gmra.mrb[40].mxu0 %v2902_v15 }
  0xc3   : > { %959 = vmatprep.mubr.bf16.mxu0 %v2904_v16 }
  0xca   : > { %960 = vmatmul.mubr.bf16.gmra.mrb[44].mxu0 %v2906_v17 }
  0xcb   : > { %969 = vmatprep.mubr.bf16.mxu0 %v2908_v18 }
  0xd2   : > { %970 = vmatmul.mubr.bf16.gmra.mrb[48].mxu0 %v2910_v19 }
  0xd3   : > { %979 = vmatprep.mubr.bf16.mxu0 %v2912_v20 }
  0xda   : > { %980 = vmatmul.mubr.bf16.gmra.mrb[52].mxu0 %v2914_v21 }
  0xdb   : > { %989 = vmatprep.mubr.bf16.mxu0 %v2916_v22 }
  0xe2   : > { %990 = vmatmul.mubr.bf16.gmra.mrb[56].mxu0 %v2918_v23 }
  0xe3   : > { %999 = vmatprep.mubr.bf16.mxu0 %v2920_v24 }
  0xea   : > { %1000 = vmatmul.mubr.bf16.gmra.mrb[60].mxu0 %v2922_v25 }
  0xeb   : > { %1042 = vmatprep.mubr.bf16.mxu0 %v3129_v4 }
  0xf2   : > { %1043 = vmatmul.mubr.bf16.vlgmr.msra.gmra.mrb[0].mxu0 %v2924_v26 }
  0xf3   : > { %1052 = vmatprep.mubr.bf16.mxu0 %v3129_v4 }
  0xfa   : > { %1053 = vmatmul.mubr.bf16.gmra.mrb[4].mxu0 %v2925_v27 }
  0xfb   : > { %1062 = vmatprep.mubr.bf16.mxu0 %v3129_v4 }
 0x102   : > { %1063 = vmatmul.mubr.bf16.gmra.mrb[8].mxu0 %v2926_v28 }
 0x103   : > { %1072 = vmatprep.mubr.bf16.mxu0 %v3129_v4 }
 0x10a   : > { %1073 = vmatmul.mubr.bf16.gmra.mrb[12].mxu0 %v2927_v29 }
 0x10b   : > { %1082 = vmatprep.mubr.bf16.mxu0 %v3129_v4 }
 0x112   : > { %1083 = vmatmul.mubr.bf16.gmra.mrb[16].mxu0 %v2928_v30 }
 0x113   : > { %1092 = vmatprep.mubr.bf16.mxu0 %v3129_v4 }
 0x11a   : > { %1093 = vmatmul.mubr.bf16.gmra.mrb[20].mxu0 %v2929_v31 }
 0x11b   : > { %1102 = vmatprep.mubr.bf16.mxu0 %v3129_v4 }
 0x122   : > { %1103 = vmatmul.mubr.bf16.gmra.mrb[24].mxu0 %v2930_v32 }
 0x123   : > { %1112 = vmatprep.mubr.bf16.mxu0 %v3129_v4 }
 0x12a   : > { %1113 = vmatmul.mubr.bf16.gmra.mrb[28].mxu0 %v2931_v33 }
 0x12b   : > { %v1124_v34 = vpop.f32.mrb[0].mxu1 }
 0x12c   : > { %v1126_v35 = vpop.f32.mrb[1].mxu1 }
 0x12d   : > { %v1128_v36 = vpop.f32.mrb[2].mxu1 }
 0x12e   : > { %v1130_v37 = vpop.f32.mrb[3].mxu1 }
 0x133   : > { %v1134_v38 = vpop.f32.mrb[4].mxu1 }
 0x134   : > { %v1136_v39 = vpop.f32.mrb[5].mxu1 }
 0x135   : > { %v1138_v40 = vpop.f32.mrb[6].mxu1 }
 0x136   : > { %v1140_v41 = vpop.f32.mrb[7].mxu1 }
 0x13b   : > { %v3514_v42 = vpop.f32.mrb[8].mxu1 }
 0x13c   : > { %v3516_v43 = vpop.f32.mrb[9].mxu1 }
 0x13d   : > { %v3518_v44 = vpop.f32.mrb[10].mxu1 }
 0x13e   : > { %v3520_v45 = vpop.f32.mrb[11].mxu1 }
 0x143   : > { %v3522_v46 = vpop.f32.mrb[12].mxu1 }
 0x144   : > { %v3524_v4 = vpop.f32.mrb[13].mxu1 }
 0x145   : > { %v3526_v47 = vpop.f32.mrb[14].mxu1 }
 0x146   : > { %v3528_v48 = vpop.f32.mrb[15].mxu1 }
 0x14b   : > { %v3530_v49 = vpop.f32.mrb[16].mxu1 }
 0x14c   : > { %v3532_v50 = vpop.f32.mrb[17].mxu1 }
 0x14d   : > { %v3534_v51 = vpop.f32.mrb[18].mxu1 }
 0x14e   : > { %v3536_v52 = vpop.f32.mrb[19].mxu1 }
 0x153   : > { %v3538_v53 = vpop.f32.mrb[20].mxu1 }
 0x154   : > { %v3540_v54 = vpop.f32.mrb[21].mxu1 }
 0x155   : > { %v3542_v55 = vpop.f32.mrb[22].mxu1 }
 0x156   : > { %v3544_v56 = vpop.f32.mrb[23].mxu1 }
 0x15b   : > { %v3546_v57 = vpop.f32.mrb[24].mxu1 }
 0x15c   : > { %v3548_v58 = vpop.f32.mrb[25].mxu1 }
 0x15d   : > { %v3550_v59 = vpop.f32.mrb[26].mxu1 }
 0x15e   : > { %v3552_v60 = vpop.f32.mrb[27].mxu1 }
 0x163   : > { %v3554_v61 = vpop.f32.mrb[28].mxu1 }
 0x164   : > { %v3556_v62 = vpop.f32.mrb[29].mxu1 }
 0x165   : > { %v3558_v0 = vpop.f32.mrb[30].mxu1 }
 0x166   : > { %v3560_v1 = vpop.f32.mrb[31].mxu1 }
 0x185   : > { %v931_v9 = vpop.f32.mrb[32].mxu0 }
 0x186   : > { %v932_v10 = vadd.f32 %v931_v9, %v3570_v7  ;;  %v933_v11 = vpop.f32.mrb[33].mxu0 }
 0x187   : > { %v934_v12 = vadd.f32 %v933_v11, %v3572_v8  ;;  %v935_v13 = vpop.f32.mrb[34].mxu0 }
 0x188   : > { %v936_v14 = vadd.f32 %v935_v13, %v3570_v7  ;;  %v1125_v15 = vadd.f32 %v1124_v34, %v932_v10  ;;  %v937_v16 = vpop.f32.mrb[35].mxu0 }
 0x189   : > { %v938_v17 = vadd.f32 %v937_v16, %v3572_v8  ;;  %v1127_v18 = vadd.f32 %v1126_v35, %v934_v12 }
 0x18a   : > { %v1129_v19 = vadd.f32 %v1128_v36, %v936_v14 }
 0x18b   : > { %v1131_v20 = vadd.f32 %v1130_v37, %v938_v17 }
 0x18c   : > { %v3578_v21 = vpack.c.bf16 %v1129_v19, %v1125_v15 }
 0x18d   : > { %v3580_v22 = vpack.c.bf16 %v1131_v20, %v1127_v18  ;;  %v941_v23 = vpop.f32.mrb[36].mxu0 }
 0x18e   : > { %v942_v24 = vadd.f32 %v941_v23, %v3570_v7  ;;  %v943_v25 = vpop.f32.mrb[37].mxu0 }
 0x18f   : > { %v944_v26 = vadd.f32 %v943_v25, %v3572_v8  ;;  %v945_v27 = vpop.f32.mrb[38].mxu0 }
 0x190   : > { %v946_v28 = vadd.f32 %v945_v27, %v3570_v7  ;;  %v1135_v29 = vadd.f32 %v1134_v38, %v942_v24  ;;  %v947_v30 = vpop.f32.mrb[39].mxu0 }
 0x191   : > { %v948_v31 = vadd.f32 %v947_v30, %v3572_v8  ;;  %v1137_v32 = vadd.f32 %v1136_v39, %v944_v26 }
 0x192   : > { %v1139_v33 = vadd.f32 %v1138_v40, %v946_v28 }
 0x193   : > { %v1141_v34 = vadd.f32 %v1140_v41, %v948_v31 }
 0x194   : > { %v3586_v35 = vpack.c.bf16 %v1139_v33, %v1135_v29 }
 0x195   : > { %v3588_v36 = vpack.c.bf16 %v1141_v34, %v1137_v32  ;;  %v951_v37 = vpop.f32.mrb[40].mxu0 }
 0x196   : > { %v952_v3 = vadd.f32 %v951_v37, %v3570_v7  ;;  %v953_v5 = vpop.f32.mrb[41].mxu0 }
 0x197   : > { %v954_v6 = vadd.f32 %v953_v5, %v3572_v8  ;;  %v955_v9 = vpop.f32.mrb[42].mxu0 }
 0x198   : > { %v956_v10 = vadd.f32 %v955_v9, %v3570_v7  ;;  %v1145_v38 = vadd.f32 %v3514_v42, %v952_v3  ;;  %v957_v11 = vpop.f32.mrb[43].mxu0 }
 0x199   : > { %v958_v39 = vadd.f32 %v957_v11, %v3572_v8  ;;  %v1147_v40 = vadd.f32 %v3516_v43, %v954_v6 }
 0x19a   : > { %v1149_v41 = vadd.f32 %v3518_v44, %v956_v10 }
 0x19b   : > { %v1151_v12 = vadd.f32 %v3520_v45, %v958_v39 }
 0x19c   : > { %v3598_v13 = vpack.c.bf16 %v1149_v41, %v1145_v38 }
 0x19d   : > { %v3600_v14 = vpack.c.bf16 %v1151_v12, %v1147_v40  ;;  %v961_v15 = vpop.f32.mrb[44].mxu0 }
 0x19e   : > { %v962_v16 = vadd.f32 %v961_v15, %v3570_v7  ;;  %v963_v17 = vpop.f32.mrb[45].mxu0 }
 0x19f   : > { %v964_v18 = vadd.f32 %v963_v17, %v3572_v8  ;;  %v965_v42 = vpop.f32.mrb[46].mxu0 }
 0x1a0   : > { %v966_v19 = vadd.f32 %v965_v42, %v3570_v7  ;;  %v1155_v20 = vadd.f32 %v3522_v46, %v962_v16  ;;  %v967_v43 = vpop.f32.mrb[47].mxu0 }
 0x1a1   : > { %v968_v44 = vadd.f32 %v967_v43, %v3572_v8  ;;  %v1157_v45 = vadd.f32 %v3524_v4, %v964_v18 }
 0x1a2   : > { %v1159_v23 = vadd.f32 %v3526_v47, %v966_v19 }
 0x1a3   : > { %v1161_v24 = vadd.f32 %v3528_v48, %v968_v44 }
 0x1a4   : > { %v3610_v25 = vpack.c.bf16 %v1159_v23, %v1155_v20 }
 0x1a5   : > { %v3612_v26 = vpack.c.bf16 %v1161_v24, %v1157_v45  ;;  %v971_v27 = vpop.f32.mrb[48].mxu0 }
 0x1a6   : > { %v972_v28 = vadd.f32 %v971_v27, %v3570_v7  ;;  %v973_v29 = vpop.f32.mrb[49].mxu0 }
 0x1a7   : > { %v974_v30 = vadd.f32 %v973_v29, %v3572_v8  ;;  %v975_v46 = vpop.f32.mrb[50].mxu0 }
 0x1a8   : > { %v976_v31 = vadd.f32 %v975_v46, %v3570_v7  ;;  %v1165_v32 = vadd.f32 %v3530_v49, %v972_v28  ;;  %v977_v4 = vpop.f32.mrb[51].mxu0 }
 0x1a9   : > { %v978_v47 = vadd.f32 %v977_v4, %v3572_v8  ;;  %v1167_v48 = vadd.f32 %v3532_v50, %v974_v30 }
 0x1aa   : > { %v1169_v33 = vadd.f32 %v3534_v51, %v976_v31 }
 0x1ab   : > { %v1171_v34 = vadd.f32 %v3536_v52, %v978_v47 }
 0x1ac   : > { %v3622_v37 = vpack.c.bf16 %v1169_v33, %v1165_v32 }
 0x1ad   : > { %v3624_v3 = vpack.c.bf16 %v1171_v34, %v1167_v48  ;;  %v981_v5 = vpop.f32.mrb[52].mxu0 }
 0x1ae   : > { %v982_v6 = vadd.f32 %v981_v5, %v3570_v7  ;;  %v983_v9 = vpop.f32.mrb[53].mxu0 }
 0x1af   : > { %v984_v10 = vadd.f32 %v983_v9, %v3572_v8  ;;  %v985_v49 = vpop.f32.mrb[54].mxu0 }
 0x1b0   : > { %v986_v38 = vadd.f32 %v985_v49, %v3570_v7  ;;  %v1175_v11 = vadd.f32 %v3538_v53, %v982_v6  ;;  %v987_v50 = vpop.f32.mrb[55].mxu0 }
 0x1b1   : > { %v988_v51 = vadd.f32 %v987_v50, %v3572_v8  ;;  %v1177_v52 = vadd.f32 %v3540_v54, %v984_v10 }
 0x1b2   : > { %v1179_v39 = vadd.f32 %v3542_v55, %v986_v38 }
 0x1b3   : > { %v1181_v40 = vadd.f32 %v3544_v56, %v988_v51 }
 0x1b4   : > { %v3634_v41 = vpack.c.bf16 %v1179_v39, %v1175_v11 }
 0x1b5   : > { %v3636_v12 = vpack.c.bf16 %v1181_v40, %v1177_v52  ;;  %v991_v15 = vpop.f32.mrb[56].mxu0 }
 0x1b6   : > { %v992_v16 = vadd.f32 %v991_v15, %v3570_v7  ;;  %v993_v17 = vpop.f32.mrb[57].mxu0 }
 0x1b7   : > { %v994_v18 = vadd.f32 %v993_v17, %v3572_v8  ;;  %v995_v53 = vpop.f32.mrb[58].mxu0 }
 0x1b8   : > { %v996_v42 = vadd.f32 %v995_v53, %v3570_v7  ;;  %v1185_v19 = vadd.f32 %v3546_v57, %v992_v16  ;;  %v997_v54 = vpop.f32.mrb[59].mxu0 }
 0x1b9   : > { %v998_v55 = vadd.f32 %v997_v54, %v3572_v8  ;;  %v1187_v56 = vadd.f32 %v3548_v58, %v994_v18 }
 0x1ba   : > { %v1189_v20 = vadd.f32 %v3550_v59, %v996_v42 }
 0x1bb   : > { %v1191_v43 = vadd.f32 %v3552_v60, %v998_v55 }
 0x1bc   : > { %v3646_v44 = vpack.c.bf16 %v1189_v20, %v1185_v19 }
 0x1bd   : > { %v3648_v45 = vpack.c.bf16 %v1191_v43, %v1187_v56  ;;  %v1001_v23 = vpop.f32.mrb[60].mxu0 }
 0x1be   : > { %v1002_v24 = vadd.f32 %v1001_v23, %v3570_v7  ;;  %v1003_v27 = vpop.f32.mrb[61].mxu0 }
 0x1bf   : > { %v1004_v28 = vadd.f32 %v1003_v27, %v3572_v8  ;;  %v1005_v57 = vpop.f32.mrb[62].mxu0 }
 0x1c0   : > { %v1006_v29 = vadd.f32 %v1005_v57, %v3570_v7  ;;  %v1195_v30 = vadd.f32 %v3554_v61, %v1002_v24  ;;  %v1007_v58 = vpop.f32.mrb[63].mxu0 }
 0x1c1   : > { %v1008_v59 = vadd.f32 %v1007_v58, %v3572_v8  ;;  %v1197_v60 = vadd.f32 %v3556_v62, %v1004_v28 }
 0x1c2   : > { %v1199_v46 = vadd.f32 %v3558_v0, %v1006_v29 }
 0x1c3   : > { %v1201_v31 = vadd.f32 %v3560_v1, %v1008_v59 }
 0x1c4   : > { %v3658_v32 = vpack.c.bf16 %v1199_v46, %v1195_v30 }
 0x1c5   : > { %v3660_v4 = vpack.c.bf16 %v1201_v31, %v1197_v60  ;;  %v1044_v47 = vpop.f32.mrb[0].mxu0 }
 0x1c6   : > { %v1046_v48 = vpop.f32.mrb[1].mxu0  ;;  %v2606_v34 = vadd.f32 %v1044_v47, %v3570_v7 }
 0x1c7   : > { %v1048_v33 = vpop.f32.mrb[2].mxu0  ;;  %v2607_v6 = vadd.f32 %v1046_v48, %v3572_v8 }
 0x1c8   : > { %v2608_v61 = vadd.f32 %v1048_v33, %v3570_v7  ;;  %v1050_v5 = vpop.f32.mrb[3].mxu0 }
 0x1c9   : > { %v2609_v62 = vadd.f32 %v1050_v5, %v3572_v8 }
 0x1ca   : > { %v1203_v0 = vpack.c.bf16 %v2608_v61, %v2606_v34 }
 0x1cb   : > { %v3666_v9 = vpack.c.bf16 %v2609_v62, %v2607_v6 }
 0x1cc   : > { %1243 = vrot.lane.b32.xlu0 %v1203_v0, %s3130_s24  ;;  %2478 = vmatprep.mubr.msk.bf16.mxu1 %vm4232_vm0, %v1203_v0 }
 0x1cd   : > { %v1054_v1 = vpop.f32.mrb[4].mxu0 }
 0x1ce   : > { %v1056_v10 = vpop.f32.mrb[5].mxu0  ;;  %v2610_v38 = vadd.f32 %v1054_v1, %v3570_v7 }
 0x1cf   : > { %v1058_v49 = vpop.f32.mrb[6].mxu0  ;;  %v2611_v51 = vadd.f32 %v1056_v10, %v3572_v8 }
 0x1d0   : > { %v2612_v11 = vadd.f32 %v1058_v49, %v3570_v7  ;;  %v1060_v50 = vpop.f32.mrb[7].mxu0 }
 0x1d1   : > { %v2613_v52 = vadd.f32 %v1060_v50, %v3572_v8 }
 0x1d2   : > { %v3674_v39 = vpack.c.bf16 %v2612_v11, %v2610_v38 }
 0x1d3   : > { %v3676_v40 = vpack.c.bf16 %v2613_v52, %v2611_v51 }
 0x1d4   : > { %1245 = vrot.lane.b32.xlu0 %v3674_v39, %s3130_s24 }
 0x1d5   : > { %v1064_v15 = vpop.f32.mrb[8].mxu0 }
 0x1d6   : > { %v1066_v16 = vpop.f32.mrb[9].mxu0  ;;  %v2614_v18 = vadd.f32 %v1064_v15, %v3570_v7 }
 0x1d7   : > { %v1068_v17 = vpop.f32.mrb[10].mxu0  ;;  %v2615_v19 = vadd.f32 %v1066_v16, %v3572_v8 }
 0x1d8   : > { %v2616_v53 = vadd.f32 %v1068_v17, %v3570_v7  ;;  %v1070_v42 = vpop.f32.mrb[11].mxu0 }
 0x1d9   : > { %v2617_v54 = vadd.f32 %v1070_v42, %v3572_v8 }
 0x1da   : > { %v3684_v55 = vpack.c.bf16 %v2616_v53, %v2614_v18 }
 0x1db   : > { %v3686_v56 = vpack.c.bf16 %v2617_v54, %v2615_v19 }
 0x1dc   : > { %1247 = vrot.lane.b32.xlu1 %v3684_v55, %s3130_s24 }
 0x1dd   : > { %v1074_v20 = vpop.f32.mrb[12].mxu0 }
 0x1de   : > { %v1076_v43 = vpop.f32.mrb[13].mxu0  ;;  %v2618_v24 = vadd.f32 %v1074_v20, %v3570_v7 }
 0x1df   : > { %v1078_v23 = vpop.f32.mrb[14].mxu0  ;;  %v2619_v57 = vadd.f32 %v1076_v43, %v3572_v8 }
 0x1e0   : > { %v2620_v27 = vadd.f32 %v1078_v23, %v3570_v7  ;;  %v1080_v28 = vpop.f32.mrb[15].mxu0 }
 0x1e1   : > { %v2621_v29 = vadd.f32 %v1080_v28, %v3572_v8 }
 0x1e2   : > { %v3694_v30 = vpack.c.bf16 %v2620_v27, %v2618_v24 }
 0x1e3   : > { %v3696_v58 = vpack.c.bf16 %v2621_v29, %v2619_v57 }
 0x1e4   : > { %1249 = vrot.lane.b32.xlu1 %v3694_v30, %s3130_s24 }
 0x1e5   : > { %v1084_v59 = vpop.f32.mrb[16].mxu0 }
 0x1e6   : > { %v1086_v60 = vpop.f32.mrb[17].mxu0  ;;  %v2622_v31 = vadd.f32 %v1084_v59, %v3570_v7 }
 0x1e7   : > { %v1088_v46 = vpop.f32.mrb[18].mxu0  ;;  %v2623_v33 = vadd.f32 %v1086_v60, %v3572_v8 }
 0x1e8   : > { %v2624_v47 = vadd.f32 %v1088_v46, %v3570_v7  ;;  %v1090_v48 = vpop.f32.mrb[19].mxu0 }
 0x1e9   : > { %v2625_v34 = vadd.f32 %v1090_v48, %v3572_v8 }
 0x1ea   : > { %v3704_v61 = vpack.c.bf16 %v2624_v47, %v2622_v31 }
 0x1eb   : > { %v3706_v5 = vpack.c.bf16 %v2625_v34, %v2623_v33 }
 0x1ec   : > { %1251 = vrot.lane.b32.xlu0 %v3704_v61, %s3130_s24 }
 0x1ed   : > { %v1094_v6 = vpop.f32.mrb[20].mxu0 }
 0x1ee   : > { %v1096_v62 = vpop.f32.mrb[21].mxu0  ;;  %v2626_v1 = vadd.f32 %v1094_v6, %v3570_v7 }
 0x1ef   : > { %v1098_v0 = vpop.f32.mrb[22].mxu0  ;;  %v2627_v38 = vadd.f32 %v1096_v62, %v3572_v8 }
 0x1f0   : > { %v2628_v10 = vadd.f32 %v1098_v0, %v3570_v7  ;;  %v1100_v49 = vpop.f32.mrb[23].mxu0 }
 0x1f1   : > { %v2629_v11 = vadd.f32 %v1100_v49, %v3572_v8 }
 0x1f2   : > { %v3714_v50 = vpack.c.bf16 %v2628_v10, %v2626_v1 }
 0x1f3   : > { %v3716_v51 = vpack.c.bf16 %v2629_v11, %v2627_v38 }
 0x1f4   : > { %1253 = vrot.lane.b32.xlu1 %v3714_v50, %s3130_s24 }
 0x1f5   : > { %v1104_v52 = vpop.f32.mrb[24].mxu0 }
 0x1f6   : > { %v1106_v15 = vpop.f32.mrb[25].mxu0  ;;  %v2630_v17 = vadd.f32 %v1104_v52, %v3570_v7 }
 0x1f7   : > { %v1108_v16 = vpop.f32.mrb[26].mxu0  ;;  %v2631_v42 = vadd.f32 %v1106_v15, %v3572_v8 }
 0x1f8   : > { %v2632_v18 = vadd.f32 %v1108_v16, %v3570_v7  ;;  %v1110_v53 = vpop.f32.mrb[27].mxu0 }
 0x1f9   : > { %v2633_v19 = vadd.f32 %v1110_v53, %v3572_v8 }
 0x1fa   : > { %v3724_v54 = vpack.c.bf16 %v2632_v18, %v2630_v17 }
 0x1fb   : > { %v3726_v20 = vpack.c.bf16 %v2633_v19, %v2631_v42 }
 0x1fc   : > { %1255 = vrot.lane.b32.xlu0 %v3724_v54, %s3130_s24 }
 0x1fd   : > { %v1114_v43 = vpop.f32.mrb[28].mxu0 }
 0x1fe   : > { %v1116_v23 = vpop.f32.mrb[29].mxu0  ;;  %v2634_v27 = vadd.f32 %v1114_v43, %v3570_v7 }
 0x1ff   : > { %v1118_v24 = vpop.f32.mrb[30].mxu0  ;;  %v2635_v29 = vadd.f32 %v1116_v23, %v3572_v8 }
 0x200   : > { %v2636_v28 = vadd.f32 %v1118_v24, %v3570_v7  ;;  %v1120_v57 = vpop.f32.mrb[31].mxu0  ;;  %1413 = vrot.lane.b32.xlu0 %v3578_v21, %s3130_s24 }
 0x201   : > { %v2637_v59 = vadd.f32 %v1120_v57, %v3572_v8 }
 0x202   : > { %v3736_v60 = vpack.c.bf16 %v2636_v28, %v2634_v27 }
 0x203   : > { %v3738_v46 = vpack.c.bf16 %v2637_v59, %v2635_v29  ;;  %v3901_v59 = vadd.s32 64, %v3563_v2 }
 0x204   : > { %1257 = vrot.lane.b32.xlu1 %v3736_v60, %s3130_s24  ;;  %1417 = vrot.lane.b32.xlu0 %v3598_v13, %s3130_s24 }
 0x208   : > { %1415 = vrot.lane.b32.xlu1 %v3586_v35, %s3130_s24  ;;  %1421 = vrot.lane.b32.xlu0 %v3622_v37, %s3130_s24 }
 0x20c   : > { %1419 = vrot.lane.b32.xlu1 %v3610_v25, %s3130_s24  ;;  %1425 = vrot.lane.b32.xlu0 %v3646_v44, %s3130_s24 }
 0x210   : > { %1423 = vrot.lane.b32.xlu1 %v3634_v41, %s3130_s24 }
 0x214   : > { %1427 = vrot.lane.b32.xlu1 %v3658_v32, %s3130_s24 }
 0x23e   : > { %v1244_v7 = vpop.permute.xlu0 %1243 }
 0x23f   : > { %v1285_v8 = vsel %vm4232_vm0, %v1244_v7, 0  ;;  %2734 = vmatprep.subr.msk.bf16.mxu1 %vm4232_vm0, %v1244_v7 }
 0x240   : > { %2463 = vmatpush3.bf16.xpose.msra.mxu1 %v1285_v8  ;;  %v3923_v8 = vadd.s32 80, %v3563_v2 }
 0x246   : > { %v1246_v31 = vpop.permute.xlu0 %1245 }
 0x247   : > { %v1288_v47 = vsel %vm4232_vm0, %v1246_v31, 0  ;;  %2735 = vmatprep.subr.msk.bf16.mxu1 %vm4232_vm0, %v1246_v31  ;;  %v3926_v31 = vadd.s32 72, %v3563_v2 }
 0x248   : > { %2465 = vmatpush3.bf16.xpose.msra.mxu1 %v1288_v47 }
 0x24e   : > { %v1248_v48 = vpop.permute.xlu1 %1247 }
 0x24f   : > { %v1291_v33 = vsel %vm4232_vm0, %v1248_v48, 0  ;;  %2736 = vmatprep.subr.msk.bf16.mxu1 %vm4232_vm0, %v1248_v48 }
 0x250   : > { %2467 = vmatpush3.bf16.xpose.msra.mxu1 %v1291_v33 }
 0x256   : > { %v1250_v34 = vpop.permute.xlu1 %1249 }
 0x257   : > { %v1294_v6 = vsel %vm4232_vm0, %v1250_v34, 0  ;;  %2737 = vmatprep.subr.msk.bf16.mxu1 %vm4232_vm0, %v1250_v34 }
 0x258   : > { %2469 = vmatpush3.bf16.xpose.msra.mxu1 %v1294_v6 }
 0x25e   : > { %v1252_v62 = vpop.permute.xlu0 %1251 }
 0x25f   : > { %v1297_v0 = vsel %vm4232_vm0, %v1252_v62, 0  ;;  %2738 = vmatprep.subr.msk.bf16.mxu1 %vm4232_vm0, %v1252_v62 }
 0x260   : > { %2471 = vmatpush3.bf16.xpose.msra.mxu1 %v1297_v0  ;;  %v3945_v0 = vadd.s32 96, %v3563_v2 }
 0x266   : > { %v1254_v1 = vpop.permute.xlu1 %1253 }
 0x267   : > { %v1300_v10 = vsel %vm4232_vm0, %v1254_v1, 0  ;;  %2739 = vmatprep.subr.msk.bf16.mxu1 %vm4232_vm0, %v1254_v1  ;;  %v3948_v1 = vadd.s32 88, %v3563_v2 }
 0x268   : > { %2473 = vmatpush3.bf16.xpose.msra.mxu1 %v1300_v10 }
 0x26e   : > { %v1256_v49 = vpop.permute.xlu0 %1255 }
 0x26f   : > { %v1303_v38 = vsel %vm4232_vm0, %v1256_v49, 0  ;;  %2740 = vmatprep.subr.msk.bf16.mxu1 %vm4232_vm0, %v1256_v49 }
 0x270   : > { %2475 = vmatpush3.bf16.xpose.msra.mxu1 %v1303_v38  ;;  %v1589_v38 = vadd.s32 112, %v3563_v2 }
 0x272   : > { %v1414_v15 = vpop.permute.xlu0 %1413 }
 0x273   : > { %v1454_v16 = vsel %vm4232_vm0, %v1414_v15, 0 }
 0x276   : > { %v1258_v11 = vpop.permute.xlu1 %1257  ;;  %v1418_v53 = vpop.permute.xlu0 %1417 }
 0x277   : > { %v1306_v52 = vsel %vm4232_vm0, %v1258_v11, 0  ;;  %2741 = vmatprep.subr.msk.bf16.mxu1 %vm4232_vm0, %v1258_v11  ;;  %v3968_v11 = vadd.s32 104, %v3563_v2 }
 0x278   : > { %2477 = vmatpush3.bf16.xpose.msra.mxu1 %v1306_v52 }
 0x279   : > { %2742 = vmatprep.subr.msk.bf16.mxu1 %vm4232_vm0, %v1414_v15 }
 0x27a   : > { %v1416_v17 = vpop.permute.xlu1 %1415 }
 0x27b   : > { %v1457_v18 = vsel %vm4232_vm0, %v1416_v17, 0 }
 0x27f   : > { %2479 = vmatmul.mubr.msk.bf16.vlgmr.msra.gmra.mrb[32].mxu1 %vm4232_vm0, %v3674_v39  ;;  %v1460_v39 = vsel %vm4232_vm0, %v1418_v53, 0 }
 0x280   : > { %2482 = vmatprep.mubr.msk.bf16.mxu1 %vm4232_vm0, %v3684_v55  ;;  %2495 = vmatpush3.bf16.xpose.msra.mxu1 %v1454_v16  ;;  %v1420_v55 = vpop.permute.xlu1 %1419 }
 0x281   : > { %2743 = vmatprep.subr.msk.bf16.mxu1 %vm4232_vm0, %v1416_v17 }
 0x284   : > { %v1424_v42 = vpop.permute.xlu1 %1423 }
 0x285   : > { %v1469_v19 = vsel %vm4232_vm0, %v1424_v42, 0 }
 0x287   : > { %2483 = vmatmul.mubr.msk.bf16.gmra.mrb[36].mxu1 %vm4232_vm0, %v3694_v30  ;;  %v1463_v30 = vsel %vm4232_vm0, %v1420_v55, 0 }
 0x288   : > { %2486 = vmatprep.mubr.msk.bf16.mxu1 %vm4232_vm0, %v3704_v61  ;;  %2497 = vmatpush3.bf16.xpose.msra.mxu1 %v1457_v18  ;;  %v1422_v61 = vpop.permute.xlu0 %1421  ;;  %v1428_v23 = vpop.permute.xlu1 %1427 }
 0x289   : > { %2744 = vmatprep.subr.msk.bf16.mxu1 %vm4232_vm0, %v1418_v53 }
 0x28f   : > { %2487 = vmatmul.mubr.msk.bf16.gmra.mrb[40].mxu1 %vm4232_vm0, %v3714_v50  ;;  %v1466_v50 = vsel %vm4232_vm0, %v1422_v61, 0 }
 0x290   : > { %2490 = vmatprep.mubr.msk.bf16.mxu1 %vm4232_vm0, %v3724_v54  ;;  %2499 = vmatpush3.bf16.xpose.msra.mxu1 %v1460_v39  ;;  %v1426_v54 = vpop.permute.xlu0 %1425  ;;  %v1590_v39 = vadd.s32 120, %v3563_v2 }
 0x291   : > { %2745 = vmatprep.subr.msk.bf16.mxu1 %vm4232_vm0, %v1420_v55  ;;  %v1472_v43 = vsel %vm4232_vm0, %v1426_v54, 0 }
 0x297   : > { %2491 = vmatmul.mubr.msk.bf16.gmra.mrb[44].mxu1 %vm4232_vm0, %v3736_v60  ;;  %v3904_v60 = vadd.s32 56, %v3563_v2 }
 0x298   : > { %2501 = vmatpush3.bf16.xpose.msra.mxu1 %v1463_v30  ;;  %2510 = vmatprep.mubr.msk.bf16.mxu1 %vm4232_vm0, %v3578_v21  ;;  %v1475_v21 = vsel %vm4232_vm0, %v1428_v23, 0 }
 0x299   : > { %2746 = vmatprep.subr.msk.bf16.mxu1 %vm4232_vm0, %v1422_v61 }
 0x2a0   : > { %2503 = vmatpush3.bf16.xpose.msra.mxu1 %v1466_v50 }
 0x2a1   : > { %2747 = vmatprep.subr.msk.bf16.mxu1 %vm4232_vm0, %v1424_v42 }
 0x2a8   : > { %2505 = vmatpush3.bf16.xpose.msra.mxu1 %v1469_v19 }
 0x2a9   : > { %2748 = vmatprep.subr.msk.bf16.mxu1 %vm4232_vm0, %v1426_v54 }
 0x2b0   : > { %2507 = vmatpush3.bf16.xpose.msra.mxu1 %v1472_v43 }
 0x2b1   : > { %2749 = vmatprep.subr.msk.bf16.mxu1 %vm4232_vm0, %v1428_v23 }
 0x2b8   : > { %2509 = vmatpush3.bf16.xpose.msra.mxu1 %v1475_v21 }
 0x2b9   : > { %2526 = vmatprep.subr.bf16.mxu1 %v3666_v9 }
 0x2bf   : > { %2511 = vmatmul.mubr.msk.bf16.vlgmr.msra.gmra.mrb[48].mxu1 %vm4232_vm0, %v3586_v35  ;;  %v3836_v35 = vand.u32 127, %v311_v63 }
 0x2c0   : > { %2514 = vmatprep.mubr.msk.bf16.mxu1 %vm4232_vm0, %v3598_v13  ;;  %2527 = vmatpush3.bf16.msra.mxu1 %v3666_v9  ;;  %v3839_v13 = vadd.s32 8, %v3563_v2  ;;  %v3857_v9 = vadd.s32 32, %v3563_v2 }
 0x2c1   : > { %2528 = vmatprep.subr.bf16.mxu1 %v3676_v40  ;;  %vm1593_vm1 = vcmp.ge.s32.totalorder %v3563_v2, %v3836_v35  ;;  %vm1601_vm8 = vcmp.ge.s32.totalorder %v3901_v59, %v3836_v35  ;;  %vm1600_vm9 = vcmp.ge.s32.totalorder %v3904_v60, %v3836_v35  ;;  %vm1603_vm10 = vcmp.ge.s32.totalorder %v3923_v8, %v3836_v35 }
 0x2c2   : > { %vm1594_vm2 = vcmp.ge.s32.totalorder %v3839_v13, %v3836_v35  ;;  %vm1597_vm4 = vcmp.ge.s32.totalorder %v3857_v9, %v3836_v35  ;;  %vm1602_vm11 = vcmp.ge.s32.totalorder %v3926_v31, %v3836_v35  ;;  %vm1605_vm12 = vcmp.ge.s32.totalorder %v3945_v0, %v3836_v35 }
 0x2c3   : > { %vm1604_vm13 = vcmp.ge.s32.totalorder %v3948_v1, %v3836_v35  ;;  %vm1607_vm14 = vcmp.ge.s32.totalorder %v1589_v38, %v3836_v35  ;;  %vm1606_vm15 = vcmp.ge.s32.totalorder %v3968_v11, %v3836_v35 }
 0x2c4   : > { %2529 = vmatpush3.bf16.msra.mxu1 %v3676_v40  ;;  %v3860_v40 = vadd.s32 24, %v3563_v2 }
 0x2c5   : > { %2530 = vmatprep.subr.bf16.mxu1 %v3686_v56 }
 0x2c6   : > { %vm1596_vm5 = vcmp.ge.s32.totalorder %v3860_v40, %v3836_v35 }
 0x2c7   : > { %2515 = vmatmul.mubr.msk.bf16.gmra.mrb[52].mxu1 %vm4232_vm0, %v3610_v25  ;;  %v3844_v25 = vadd.s32 16, %v3563_v2 }
 0x2c8   : > { %2518 = vmatprep.mubr.msk.bf16.mxu1 %vm4232_vm0, %v3622_v37  ;;  %2531 = vmatpush3.bf16.msra.mxu1 %v3686_v56 }
 0x2c9   : > { %2532 = vmatprep.subr.bf16.mxu1 %v3696_v58  ;;  %vm1595_vm3 = vcmp.ge.s32.totalorder %v3844_v25, %v3836_v35 }
 0x2cc   : > { %2533 = vmatpush3.bf16.msra.mxu1 %v3696_v58 }
 0x2cd   : > { %2534 = vmatprep.subr.bf16.mxu1 %v3706_v5 }
 0x2cf   : > { %2519 = vmatmul.mubr.msk.bf16.gmra.mrb[56].mxu1 %vm4232_vm0, %v3634_v41 }
 0x2d0   : > { %2522 = vmatprep.mubr.msk.bf16.mxu1 %vm4232_vm0, %v3646_v44  ;;  %2535 = vmatpush3.bf16.msra.mxu1 %v3706_v5  ;;  %v3879_v5 = vadd.s32 48, %v3563_v2 }
 0x2d1   : > { %2536 = vmatprep.subr.bf16.mxu1 %v3716_v51 }
 0x2d2   : > { %vm1599_vm6 = vcmp.ge.s32.totalorder %v3879_v5, %v3836_v35 }
 0x2d4   : > { %2537 = vmatpush3.bf16.msra.mxu1 %v3716_v51  ;;  %v3882_v51 = vadd.s32 40, %v3563_v2 }
 0x2d5   : > { %2538 = vmatprep.subr.bf16.mxu1 %v3726_v20 }
 0x2d6   : > { %vm1598_vm7 = vcmp.ge.s32.totalorder %v3882_v51, %v3836_v35 }
 0x2d7   : > { %2523 = vmatmul.mubr.msk.bf16.gmra.mrb[60].mxu1 %vm4232_vm0, %v3658_v32  ;;  %vm1608_vm0 = vcmp.ge.s32.totalorder %v1590_v39, %v3836_v35 }
 0x2d8   : > { %2539 = vmatpush3.bf16.msra.mxu1 %v3726_v20 }
 0x2d9   : > { %2540 = vmatprep.subr.bf16.mxu1 %v3738_v46 }
 0x2dc   : > { %2541 = vmatpush3.bf16.msra.mxu1 %v3738_v46 }
 0x2dd   : > { %2558 = vmatprep.subr.bf16.mxu1 %v3580_v22 }
 0x352   : > { %v2480_v37 = vpop.f32.mrb[32].mxu1 }
 0x353   : > { %v1342_v41 = vpop.f32.mrb[33].mxu1  ;;  %v3871_v58 = vsel %vm1595_vm3, %v2480_v37, -inf }
 0x354   : > { %v2481_v44 = vpop.f32.mrb[34].mxu1  ;;  %v3851_v63 = vsel %vm1593_vm1, %v1342_v41, -inf }
 0x355   : > { %v1345_v32 = vpop.f32.mrb[35].mxu1  ;;  %1673 = vmax.xlane.f32.xlu0 %v3851_v63  ;;  %v3892_v57 = vsel %vm1596_vm5, %v2481_v44, -inf }
 0x356   : > { %v3865_v56 = vsel %vm1594_vm2, %v1345_v32, -inf }
 0x357   : > { %1675 = vmax.xlane.f32.xlu1 %v3865_v56 }
 0x359   : > { %1677 = vmax.xlane.f32.xlu0 %v3871_v58 }
 0x35a   : > { %v2484_v20 = vpop.f32.mrb[36].mxu1 }
 0x35b   : > { %v1358_v24 = vpop.f32.mrb[37].mxu1  ;;  %v3909_v46 = vsel %vm1599_vm6, %v2484_v20, -inf }
 0x35c   : > { %v2485_v27 = vpop.f32.mrb[38].mxu1  ;;  %v3887_v28 = vsel %vm1597_vm4, %v1358_v24, -inf }
 0x35d   : > { %v1361_v29 = vpop.f32.mrb[39].mxu1  ;;  %1681 = vmax.xlane.f32.xlu1 %v3887_v28  ;;  %1679 = vmax.xlane.f32.xlu0 %v3892_v57  ;;  %v3936_v6 = vsel %vm1600_vm9, %v2485_v27, -inf }
 0x35e   : > { %v3914_v7 = vsel %vm1598_vm7, %v1361_v29, -inf }
 0x361   : > { %1685 = vmax.xlane.f32.xlu1 %v3909_v46  ;;  %1683 = vmax.xlane.f32.xlu0 %v3914_v7 }
 0x362   : > { %v2488_v47 = vpop.f32.mrb[40].mxu1 }
 0x363   : > { %v1374_v48 = vpop.f32.mrb[41].mxu1  ;;  %v3953_v10 = vsel %vm1603_vm10, %v2488_v47, -inf }
 0x364   : > { %v2489_v33 = vpop.f32.mrb[42].mxu1  ;;  %v3931_v34 = vsel %vm1601_vm8, %v1374_v48, -inf }
 0x365   : > { %v1377_v62 = vpop.f32.mrb[43].mxu1  ;;  %1689 = vmax.xlane.f32.xlu1 %v3931_v34  ;;  %1687 = vmax.xlane.f32.xlu0 %v3936_v6  ;;  %v3978_v18 = vsel %vm1604_vm13, %v2489_v33, -inf }
 0x366   : > { %v3958_v49 = vsel %vm1602_vm11, %v1377_v62, -inf }
 0x369   : > { %1693 = vmax.xlane.f32.xlu1 %v3953_v10  ;;  %1691 = vmax.xlane.f32.xlu0 %v3958_v49 }
 0x36a   : > { %v2492_v52 = vpop.f32.mrb[44].mxu1 }
 0x36b   : > { %v1390_v15 = vpop.f32.mrb[45].mxu1  ;;  %v3988_v55 = vsel %vm1607_vm14, %v2492_v52, -inf }
 0x36c   : > { %v2493_v16 = vpop.f32.mrb[46].mxu1  ;;  %v3973_v17 = vsel %vm1605_vm12, %v1390_v15, -inf }
 0x36d   : > { %v1393_v53 = vpop.f32.mrb[47].mxu1  ;;  %1697 = vmax.xlane.f32.xlu1 %v3973_v17  ;;  %1695 = vmax.xlane.f32.xlu0 %v3978_v18  ;;  %v4000_v61 = vsel %vm1608_vm0, %v2493_v16, -inf }
 0x36e   : > { %v3993_v30 = vsel %vm1606_vm15, %v1393_v53, -inf }
 0x371   : > { %1701 = vmax.xlane.f32.xlu1 %v3988_v55  ;;  %1699 = vmax.xlane.f32.xlu0 %v3993_v30 }
 0x375   : > { %1703 = vmax.xlane.f32.xlu0 %v4000_v61 }
 0x392   : > { %v2512_v50 = vpop.f32.mrb[48].mxu1 }
 0x393   : > { %v1511_v42 = vpop.f32.mrb[49].mxu1  ;;  %v4006_v19 = vsel %vm1595_vm3, %v2512_v50, -inf }
 0x394   : > { %v2513_v54 = vpop.f32.mrb[50].mxu1  ;;  %v4011_v43 = vsel %vm1593_vm1, %v1511_v42, -inf }
 0x395   : > { %1705 = vmax.xlane.f32.xlu1 %v4011_v43  ;;  %v1514_v23 = vpop.f32.mrb[51].mxu1  ;;  %v4024_v37 = vsel %vm1596_vm5, %v2513_v54, -inf }
 0x396   : > { %v4017_v21 = vsel %vm1594_vm2, %v1514_v23, -inf }
 0x397   : > { %1707 = vmax.xlane.f32.xlu0 %v4017_v21 }
 0x399   : > { %1709 = vmax.xlane.f32.xlu1 %v4006_v19 }
 0x39a   : > { %v2516_v25 = vpop.f32.mrb[52].mxu1 }
 0x39b   : > { %1711 = vmax.xlane.f32.xlu0 %v4024_v37  ;;  %v1527_v2 = vpop.f32.mrb[53].mxu1  ;;  %v4030_v41 = vsel %vm1599_vm6, %v2516_v25, -inf }
 0x39c   : > { %v2517_v13 = vpop.f32.mrb[54].mxu1  ;;  %v4035_v44 = vsel %vm1597_vm4, %v1527_v2, -inf }
 0x39d   : > { %1713 = vmax.xlane.f32.xlu1 %v4035_v44  ;;  %v1530_v32 = vpop.f32.mrb[55].mxu1  ;;  %v4048_v20 = vsel %vm1600_vm9, %v2517_v13, -inf }
 0x39e   : > { %v4041_v40 = vsel %vm1598_vm7, %v1530_v32, -inf }
 0x39f   : > { %1715 = vmax.xlane.f32.xlu0 %v4041_v40 }
 0x3a1   : > { %1717 = vmax.xlane.f32.xlu1 %v4030_v41 }
 0x3a2   : > { %v2520_v5 = vpop.f32.mrb[56].mxu1 }
 0x3a3   : > { %1719 = vmax.xlane.f32.xlu0 %v4048_v20  ;;  %v1543_v9 = vpop.f32.mrb[57].mxu1  ;;  %v4054_v24 = vsel %vm1603_vm10, %v2520_v5, -inf }
 0x3a4   : > { %v2521_v51 = vpop.f32.mrb[58].mxu1  ;;  %v4059_v27 = vsel %vm1601_vm8, %v1543_v9, -inf }
 0x3a5   : > { %1721 = vmax.xlane.f32.xlu1 %v4059_v27  ;;  %v1546_v29 = vpop.f32.mrb[59].mxu1  ;;  %v4072_v47 = vsel %vm1604_vm13, %v2521_v51, -inf }
 0x3a6   : > { %v4065_v60 = vsel %vm1602_vm11, %v1546_v29, -inf }
 0x3a7   : > { %1723 = vmax.xlane.f32.xlu0 %v4065_v60 }
 0x3a9   : > { %1725 = vmax.xlane.f32.xlu1 %v4054_v24 }
 0x3aa   : > { %v2524_v8 = vpop.f32.mrb[60].mxu1 }
 0x3ab   : > { %1727 = vmax.xlane.f32.xlu0 %v4072_v47  ;;  %v1559_v59 = vpop.f32.mrb[61].mxu1  ;;  %v4077_v48 = vsel %vm1607_vm14, %v2524_v8, -inf }
 0x3ac   : > { %v2525_v31 = vpop.f32.mrb[62].mxu1  ;;  %v4082_v33 = vsel %vm1605_vm12, %v1559_v59, -inf }
 0x3ad   : > { %1729 = vmax.xlane.f32.xlu1 %v4082_v33  ;;  %v1562_v62 = vpop.f32.mrb[63].mxu1  ;;  %v4094_v38 = vsel %vm1608_vm0, %v2525_v31, -inf  ;;  %vm4236_vm0 = vcmask 523264  }
 0x3ae   : > { %v4088_v1 = vsel %vm1606_vm15, %v1562_v62, -inf  ;;  %vm4237_vm1 = vmmov %vm4236_vm0 }
 0x3af   : > { %1731 = vmax.xlane.f32.xlu0 %v4088_v1  ;;  %vm4238_vm2 = vmmov %vm4236_vm0 }
 0x3b0   : > { %vm4239_vm3 = vmmov %vm4236_vm0 }
 0x3b1   : > { %1733 = vmax.xlane.f32.xlu1 %v4077_v48  ;;  %vm4240_vm4 = vmmov %vm4236_vm0 }
 0x3b2   : > { %vm4241_vm5 = vmmov %vm4236_vm0 }
 0x3b3   : > { %1735 = vmax.xlane.f32.xlu0 %v4094_v38  ;;  %vm4242_vm6 = vmmov %vm4236_vm0 }
 0x3b4   : > { %vm4243_vm7 = vmmov %vm4236_vm0 }
 0x3b5   : > { %vm4244_vm8 = vmmov %vm4236_vm0 }
 0x3b6   : > { %vm4245_vm9 = vmmov %vm4236_vm0 }
 0x3b7   : > { %vm4246_vm10 = vmmov %vm4236_vm0 }
 0x3b8   : > { %vm4247_vm11 = vmmov %vm4236_vm0 }
 0x3b9   : > { %vm4248_vm12 = vmmov %vm4236_vm0 }
 0x3ba   : > { %vm4249_vm13 = vmmov %vm4236_vm0 }
 0x3bb   : > { %vm4250_vm14 = vmmov %vm4236_vm0 }
 0x3bc   : > { %vm4251_vm15 = vmmov %vm4236_vm0 }
 0x3e2   : > { %v1674_v0 = vpop.xlane.xlu0 %1673 }
 0x3e3   : > { %v1737_v52 = vsub.f32 %v3851_v63, %v1674_v0 }
 0x3e4   : > { %v1676_v15 = vpop.xlane.xlu1 %1675 }
 0x3e5   : > { %v1769_v16 = vmul.f32 1.442695, %v1737_v52  ;;  %v1738_v53 = vsub.f32 %v3865_v56, %v1676_v15 }
 0x3e6   : > { %v1678_v11 = vpop.xlane.xlu0 %1677 }
 0x3e7   : > { %v1771_v50 = vmul.f32 1.442695, %v1738_v53  ;;  %v1739_v42 = vsub.f32 %v3871_v58, %v1678_v11  ;;  %2932 = vpow2.f32 %v1769_v16 }
 0x3e9   : > { %2934 = vpow2.f32 %v1771_v50  ;;  %v1773_v54 = vmul.f32 1.442695, %v1739_v42 }
 0x3ea   : > { %v1682_v23 = vpop.xlane.xlu1 %1681  ;;  %v1680_v35 = vpop.xlane.xlu0 %1679 }
 0x3eb   : > { %2936 = vpow2.f32 %v1773_v54  ;;  %v1741_v39 = vsub.f32 %v3887_v28, %v1682_v23  ;;  %v1740_v25 = vsub.f32 %v3892_v57, %v1680_v35 }
 0x3ed   : > { %v1775_v2 = vmul.f32 1.442695, %v1740_v25  ;;  %v1777_v63 = vmul.f32 1.442695, %v1741_v39 }
 0x3ee   : > { %v1686_v13 = vpop.xlane.xlu1 %1685  ;;  %v1684_v32 = vpop.xlane.xlu0 %1683 }
 0x3ef   : > { %v1743_v56 = vsub.f32 %v3909_v46, %v1686_v13  ;;  %v1742_v5 = vsub.f32 %v3914_v7, %v1684_v32  ;;  %2938 = vpow2.f32 %v1775_v2 }
 0x3f0   : > { %2940 = vpow2.f32 %v1777_v63 }
 0x3f1   : > { %v1781_v58 = vmul.f32 1.442695, %v1743_v56  ;;  %v1779_v9 = vmul.f32 1.442695, %v1742_v5  ;;  %v2933_v51 = vpop.eup %2932 }
 0x3f2   : > { %v1690_v29 = vpop.xlane.xlu1 %1689  ;;  %v1688_v8 = vpop.xlane.xlu0 %1687 }
 0x3f3   : > { %v2935_v59 = vpop.eup %2934  ;;  %2942 = vpow2.f32 %v1781_v58  ;;  %v1745_v28 = vsub.f32 %v3931_v34, %v1690_v29  ;;  %v1744_v57 = vsub.f32 %v3936_v6, %v1688_v8 }
 0x3f4   : > { %2944 = vpow2.f32 %v1779_v9  ;;  %v1897_v31 = vpack.c.bf16 %v2935_v59, %v2933_v51 }
 0x3f5   : > { %v2937_v62 = vpop.eup %2936  ;;  %v1783_v0 = vmul.f32 1.442695, %v1744_v57  ;;  %v1785_v46 = vmul.f32 1.442695, %v1745_v28 }
 0x3f6   : > { %v1694_v52 = vpop.xlane.xlu1 %1693  ;;  %v1692_v7 = vpop.xlane.xlu0 %1691  ;;  %2542 = vmatprep.mubr.bf16.mxu1 %v1897_v31  ;;  %1837 = vadd.xlane.f32.xlu1 %v2937_v62 }
 0x3f7   : > { %v1747_v15 = vsub.f32 %v3953_v10, %v1694_v52  ;;  %v1746_v16 = vsub.f32 %v3958_v49, %v1692_v7  ;;  %2946 = vpow2.f32 %v1783_v0 }
 0x3f8   : > { %2948 = vpow2.f32 %v1785_v46 }
 0x3f9   : > { %v1789_v53 = vmul.f32 1.442695, %v1747_v15  ;;  %v1787_v11 = vmul.f32 1.442695, %v1746_v16  ;;  %v2939_v50 = vpop.eup %2938 }
 0x3fa   : > { %v1698_v34 = vpop.xlane.xlu1 %1697  ;;  %v1696_v6 = vpop.xlane.xlu0 %1695  ;;  %1833 = vadd.xlane.f32.xlu1 %v2933_v51  ;;  %1839 = vadd.xlane.f32.xlu0 %v2939_v50  ;;  %v1898_v23 = vpack.c.bf16 %v2939_v50, %v2937_v62 }
 0x3fb   : > { %2950 = vpow2.f32 %v1789_v53  ;;  %v1749_v42 = vsub.f32 %v3973_v17, %v1698_v34  ;;  %v1748_v54 = vsub.f32 %v3978_v18, %v1696_v6  ;;  %v2941_v35 = vpop.eup %2940 }
 0x3fc   : > { %2952 = vpow2.f32 %v1787_v11  ;;  %2543 = vmatmul.mubr.bf16.vlgmr.msra.gmra.mrb[64].mxu1 %v1898_v23 }
 0x3fd   : > { %v2943_v10 = vpop.eup %2942  ;;  %v1791_v39 = vmul.f32 1.442695, %v1748_v54  ;;  %v1793_v25 = vmul.f32 1.442695, %v1749_v42  ;;  %2559 = vmatpush3.bf16.msra.mxu1 %v3580_v22 }
 0x3fe   : > { %v2945_v49 = vpop.eup %2944  ;;  %v1702_v2 = vpop.xlane.xlu1 %1701  ;;  %1845 = vadd.xlane.f32.xlu1 %v2943_v10  ;;  %2560 = vmatprep.subr.bf16.mxu1 %v3588_v36 }
 0x3ff   : > { %v1700_v63 = vpop.xlane.xlu0 %1699  ;;  %v1751_v17 = vsub.f32 %v3988_v55, %v1702_v2  ;;  %1835 = vadd.xlane.f32.xlu0 %v2935_v59  ;;  %v1899_v13 = vpack.c.bf16 %v2945_v49, %v2941_v35  ;;  %2954 = vpow2.f32 %v1791_v39 }
 0x400   : > { %v1750_v18 = vsub.f32 %v3993_v30, %v1700_v63  ;;  %2956 = vpow2.f32 %v1793_v25 }
 0x401   : > { %v1797_v32 = vmul.f32 1.442695, %v1751_v17  ;;  %2546 = vmatprep.mubr.bf16.mxu1 %v1899_v13  ;;  %v2947_v5 = vpop.eup %2946  ;;  %2561 = vmatpush3.bf16.msra.mxu1 %v3588_v36 }
 0x402   : > { %v1795_v56 = vmul.f32 1.442695, %v1750_v18  ;;  %1841 = vadd.xlane.f32.xlu1 %v2941_v35  ;;  %2562 = vmatprep.subr.bf16.mxu1 %v3600_v14  ;;  %v1900_v55 = vpack.c.bf16 %v2947_v5, %v2943_v10  ;;  %v2949_v30 = vpop.eup %2948 }
 0x403   : > { %v1704_v22 = vpop.xlane.xlu0 %1703  ;;  %2958 = vpow2.f32 %v1797_v32  ;;  %1847 = vadd.xlane.f32.xlu0 %v2947_v5 }
 0x404   : > { %v1752_v58 = vsub.f32 %v4000_v61, %v1704_v22  ;;  %2960 = vpow2.f32 %v1795_v56  ;;  %2547 = vmatmul.mubr.bf16.gmra.mrb[68].mxu1 %v1900_v55 }
 0x405   : > { %v2951_v9 = vpop.eup %2950  ;;  %2563 = vmatpush3.bf16.msra.mxu1 %v3600_v14 }
 0x406   : > { %v1799_v51 = vmul.f32 1.442695, %v1752_v58  ;;  %v2953_v29 = vpop.eup %2952  ;;  %1853 = vadd.xlane.f32.xlu1 %v2951_v9  ;;  %2564 = vmatprep.subr.bf16.mxu1 %v3612_v26 }
 0x407   : > { %1843 = vadd.xlane.f32.xlu0 %v2945_v49  ;;  %v1901_v36 = vpack.c.bf16 %v2953_v29, %v2949_v30 }
 0x408   : > { %2962 = vpow2.f32 %v1799_v51 }
 0x409   : > { %2550 = vmatprep.mubr.bf16.mxu1 %v1901_v36  ;;  %v2955_v8 = vpop.eup %2954  ;;  %2565 = vmatpush3.bf16.msra.mxu1 %v3612_v26 }
 0x40a   : > { %1849 = vadd.xlane.f32.xlu1 %v2949_v30  ;;  %2566 = vmatprep.subr.bf16.mxu1 %v3624_v3  ;;  %v1902_v61 = vpack.c.bf16 %v2955_v8, %v2951_v9  ;;  %v2957_v59 = vpop.eup %2956 }
 0x40b   : > { %1855 = vadd.xlane.f32.xlu0 %v2955_v8 }
 0x40c   : > { %2551 = vmatmul.mubr.bf16.gmra.mrb[72].mxu1 %v1902_v61 }
 0x40d   : > { %v2959_v28 = vpop.eup %2958  ;;  %2567 = vmatpush3.bf16.msra.mxu1 %v3624_v3 }
 0x40e   : > { %v2961_v57 = vpop.eup %2960  ;;  %1861 = vadd.xlane.f32.xlu1 %v2959_v28  ;;  %2568 = vmatprep.subr.bf16.mxu1 %v3636_v12 }
 0x40f   : > { %1851 = vadd.xlane.f32.xlu0 %v2953_v29  ;;  %v1903_v14 = vpack.c.bf16 %v2961_v57, %v2957_v59 }
 0x411   : > { %2554 = vmatprep.mubr.bf16.mxu1 %v1903_v14  ;;  %2569 = vmatpush3.bf16.msra.mxu1 %v3636_v12 }
 0x412   : > { %v2963_v31 = vpop.eup %2962  ;;  %1857 = vadd.xlane.f32.xlu1 %v2957_v59  ;;  %2570 = vmatprep.subr.bf16.mxu1 %v3648_v45 }
 0x413   : > { %v1904_v26 = vpack.c.bf16 %v2963_v31, %v2959_v28  ;;  %1863 = vadd.xlane.f32.xlu0 %v2963_v31 }
 0x415   : > { %2555 = vmatmul.mubr.bf16.gmra.mrb[76].mxu1 %v1904_v26 }
 0x416   : > { %2571 = vmatpush3.bf16.msra.mxu1 %v3648_v45 }
 0x417   : > { %2572 = vmatprep.subr.bf16.mxu1 %v3660_v4  ;;  %1859 = vadd.xlane.f32.xlu0 %v2961_v57 }
 0x41a   : > { %2573 = vmatpush3.bf16.msra.mxu1 %v3660_v4 }
 0x422   : > { %v1706_v3 = vpop.xlane.xlu1 %1705 }
 0x423   : > { %v1753_v62 = vsub.f32 %v4011_v43, %v1706_v3 }
 0x424   : > { %v1708_v0 = vpop.xlane.xlu0 %1707 }
 0x425   : > { %v1801_v46 = vmul.f32 1.442695, %v1753_v62  ;;  %v1754_v12 = vsub.f32 %v4017_v21, %v1708_v0 }
 0x426   : > { %v1710_v52 = vpop.xlane.xlu1 %1709 }
 0x427   : > { %v1803_v7 = vmul.f32 1.442695, %v1754_v12  ;;  %v1755_v15 = vsub.f32 %v4006_v19, %v1710_v52  ;;  %2964 = vpow2.f32 %v1801_v46 }
 0x428   : > { %v1712_v16 = vpop.xlane.xlu0 %1711 }
 0x429   : > { %2966 = vpow2.f32 %v1803_v7  ;;  %v1805_v45 = vmul.f32 1.442695, %v1755_v15  ;;  %v1756_v53 = vsub.f32 %v4024_v37, %v1712_v16 }
 0x42a   : > { %v1714_v11 = vpop.xlane.xlu1 %1713 }
 0x42b   : > { %2968 = vpow2.f32 %v1805_v45  ;;  %v1807_v4 = vmul.f32 1.442695, %v1756_v53  ;;  %v1757_v50 = vsub.f32 %v4035_v44, %v1714_v11 }
 0x42c   : > { %v1716_v43 = vpop.xlane.xlu0 %1715 }
 0x42d   : > { %2970 = vpow2.f32 %v1807_v4  ;;  %v1809_v34 = vmul.f32 1.442695, %v1757_v50  ;;  %v1758_v21 = vsub.f32 %v4041_v40, %v1716_v43 }
 0x42e   : > { %v1718_v6 = vpop.xlane.xlu1 %1717 }
 0x42f   : > { %v1811_v42 = vmul.f32 1.442695, %v1758_v21  ;;  %v1759_v19 = vsub.f32 %v4030_v41, %v1718_v6  ;;  %2972 = vpow2.f32 %v1809_v34 }
 0x430   : > { %v1720_v54 = vpop.xlane.xlu0 %1719 }
 0x431   : > { %2974 = vpow2.f32 %v1811_v42  ;;  %v1813_v23 = vmul.f32 1.442695, %v1759_v19  ;;  %v1760_v37 = vsub.f32 %v4048_v20, %v1720_v54  ;;  %v2965_v35 = vpop.eup %2964 }
 0x432   : > { %v1722_v10 = vpop.xlane.xlu1 %1721 }
 0x433   : > { %v2967_v39 = vpop.eup %2966  ;;  %2976 = vpow2.f32 %v1813_v23  ;;  %v1815_v44 = vmul.f32 1.442695, %v1760_v37  ;;  %v1761_v49 = vsub.f32 %v4059_v27, %v1722_v10 }
 0x434   : > { %v1724_v25 = vpop.xlane.xlu0 %1723  ;;  %v1905_v2 = vpack.c.bf16 %v2967_v39, %v2965_v35 }
 0x435   : > { %v2969_v40 = vpop.eup %2968  ;;  %2978 = vpow2.f32 %v1815_v44  ;;  %v1817_v63 = vmul.f32 1.442695, %v1761_v49  ;;  %v1762_v41 = vsub.f32 %v4065_v60, %v1724_v25 }
 0x436   : > { %2574 = vmatprep.mubr.bf16.mxu1 %v1905_v2  ;;  %v1726_v17 = vpop.xlane.xlu1 %1725  ;;  %1869 = vadd.xlane.f32.xlu1 %v2969_v40 }
 0x437   : > { %v2971_v18 = vpop.eup %2970  ;;  %v1819_v13 = vmul.f32 1.442695, %v1762_v41  ;;  %v1763_v20 = vsub.f32 %v4054_v24, %v1726_v17  ;;  %2980 = vpow2.f32 %v1817_v63 }
 0x438   : > { %v1728_v32 = vpop.xlane.xlu0 %1727  ;;  %1871 = vadd.xlane.f32.xlu0 %v2971_v18  ;;  %v1906_v56 = vpack.c.bf16 %v2971_v18, %v2969_v40 }
 0x439   : > { %2982 = vpow2.f32 %v1819_v13  ;;  %v1821_v27 = vmul.f32 1.442695, %v1763_v20  ;;  %v1764_v5 = vsub.f32 %v4072_v47, %v1728_v32  ;;  %v2973_v22 = vpop.eup %2972 }
 0x43a   : > { %2575 = vmatmul.mubr.bf16.vlgmr.msra.gmra.mrb[80].mxu1 %v1906_v56  ;;  %1865 = vadd.xlane.f32.xlu1 %v2965_v35  ;;  %v1730_v58 = vpop.xlane.xlu1 %1729 }
 0x43b   : > { %v2975_v60 = vpop.eup %2974  ;;  %2984 = vpow2.f32 %v1821_v27  ;;  %v1823_v55 = vmul.f32 1.442695, %v1764_v5  ;;  %v1765_v30 = vsub.f32 %v4082_v33, %v1730_v58 }
 0x43c   : > { %1867 = vadd.xlane.f32.xlu0 %v2967_v39  ;;  %v1732_v9 = vpop.xlane.xlu0 %1731  ;;  %v1907_v24 = vpack.c.bf16 %v2975_v60, %v2973_v22 }
 0x43d   : > { %v2977_v51 = vpop.eup %2976  ;;  %2986 = vpow2.f32 %v1823_v55  ;;  %v1825_v29 = vmul.f32 1.442695, %v1765_v30  ;;  %v1766_v36 = vsub.f32 %v4088_v1, %v1732_v9 }
 0x43e   : > { %2578 = vmatprep.mubr.bf16.mxu1 %v1907_v24  ;;  %1877 = vadd.xlane.f32.xlu1 %v2977_v51  ;;  %v1734_v47 = vpop.xlane.xlu1 %1733 }
 0x43f   : > { %v2979_v8 = vpop.eup %2978  ;;  %v1827_v61 = vmul.f32 1.442695, %v1766_v36  ;;  %v1767_v59 = vsub.f32 %v4077_v48, %v1734_v47  ;;  %2988 = vpow2.f32 %v1825_v29 }
 0x440   : > { %1879 = vadd.xlane.f32.xlu0 %v2979_v8  ;;  %v1736_v28 = vpop.xlane.xlu0 %1735  ;;  %v1908_v57 = vpack.c.bf16 %v2979_v8, %v2977_v51 }
 0x441   : > { %2990 = vpow2.f32 %v1827_v61  ;;  %v1829_v33 = vmul.f32 1.442695, %v1767_v59  ;;  %v1768_v14 = vsub.f32 %v4094_v38, %v1736_v28  ;;  %v2981_v31 = vpop.eup %2980 }
 0x442   : > { %2579 = vmatmul.mubr.bf16.gmra.mrb[84].mxu1 %v1908_v57  ;;  %1873 = vadd.xlane.f32.xlu1 %v2973_v22 }
 0x443   : > { %v2983_v26 = vpop.eup %2982  ;;  %v1831_v1 = vmul.f32 1.442695, %v1768_v14  ;;  %2992 = vpow2.f32 %v1829_v33 }
 0x444   : > { %1875 = vadd.xlane.f32.xlu0 %v2975_v60  ;;  %v1909_v3 = vpack.c.bf16 %v2983_v26, %v2981_v31 }
 0x445   : > { %v2985_v62 = vpop.eup %2984  ;;  %2994 = vpow2.f32 %v1831_v1 }
 0x446   : > { %2582 = vmatprep.mubr.bf16.mxu1 %v1909_v3  ;;  %1885 = vadd.xlane.f32.xlu1 %v2985_v62 }
 0x447   : > { %v2987_v48 = vpop.eup %2986 }
 0x448   : > { %1887 = vadd.xlane.f32.xlu0 %v2987_v48  ;;  %v1910_v0 = vpack.c.bf16 %v2987_v48, %v2985_v62 }
 0x449   : > { %v2989_v46 = vpop.eup %2988 }
 0x44a   : > { %2583 = vmatmul.mubr.bf16.gmra.mrb[88].mxu1 %v1910_v0  ;;  %1881 = vadd.xlane.f32.xlu1 %v2981_v31 }
 0x44b   : > { %v2991_v12 = vpop.eup %2990 }
 0x44c   : > { %1883 = vadd.xlane.f32.xlu0 %v2983_v26  ;;  %v1911_v38 = vpack.c.bf16 %v2991_v12, %v2989_v46 }
 0x44d   : > { %v2993_v52 = vpop.eup %2992 }
 0x44e   : > { %1889 = vadd.xlane.f32.xlu1 %v2989_v46  ;;  %2586 = vmatprep.mubr.bf16.mxu1 %v1911_v38 }
 0x44f   : > { %v2995_v7 = vpop.eup %2994 }
 0x450   : > { %1891 = vadd.xlane.f32.xlu0 %v2991_v12  ;;  %v1912_v15 = vpack.c.bf16 %v2995_v7, %v2993_v52 }
 0x452   : > { %1893 = vadd.xlane.f32.xlu1 %v2993_v52  ;;  %2587 = vmatmul.mubr.bf16.gmra.mrb[92].mxu1 %v1912_v15 }
 0x454   : > { %1895 = vadd.xlane.f32.xlu0 %v2995_v7 }
 0x483   : > { %v1838_v16 = vpop.xlane.xlu1 %1837 }
 0x484   : > { %2996 = vrcp.f32 %v1838_v16 }
 0x487   : > { %v1840_v45 = vpop.xlane.xlu0 %1839  ;;  %v1834_v53 = vpop.xlane.xlu1 %1833 }
 0x488   : > { %2998 = vrcp.f32 %v1834_v53 }
 0x489   : > { %3000 = vrcp.f32 %v1840_v45 }
 0x48b   : > { %v1846_v4 = vpop.xlane.xlu1 %1845 }
 0x48c   : > { %v1836_v11 = vpop.xlane.xlu0 %1835 }
 0x48d   : > { %3002 = vrcp.f32 %v1836_v11 }
 0x48e   : > { %3004 = vrcp.f32 %v1846_v4  ;;  %v2997_v42 = vpop.eup %2996 }
 0x48f   : > { %v1842_v43 = vpop.xlane.xlu1 %1841 }
 0x490   : > { %v1848_v50 = vpop.xlane.xlu0 %1847  ;;  %3006 = vrcp.f32 %v1842_v43 }
 0x491   : > { %3008 = vrcp.f32 %v1848_v50 }
 0x492   : > { %v2999_v23 = vpop.eup %2998 }
 0x493   : > { %v1854_v21 = vpop.xlane.xlu1 %1853  ;;  %v3001_v10 = vpop.eup %3000 }
 0x494   : > { %v1844_v34 = vpop.xlane.xlu0 %1843 }
 0x495   : > { %3010 = vrcp.f32 %v1844_v34 }
 0x496   : > { %3012 = vrcp.f32 %v1854_v21 }
 0x497   : > { %v1850_v19 = vpop.xlane.xlu1 %1849  ;;  %v3003_v25 = vpop.eup %3002 }
 0x498   : > { %v1856_v6 = vpop.xlane.xlu0 %1855  ;;  %3014 = vrcp.f32 %v1850_v19  ;;  %v3005_v17 = vpop.eup %3004 }
 0x499   : > { %3016 = vrcp.f32 %v1856_v6 }
 0x49a   : > { %v3007_v20 = vpop.eup %3006 }
 0x49b   : > { %v1862_v41 = vpop.xlane.xlu1 %1861  ;;  %v3009_v27 = vpop.eup %3008 }
 0x49c   : > { %v1852_v39 = vpop.xlane.xlu0 %1851 }
 0x49d   : > { %3018 = vrcp.f32 %v1852_v39 }
 0x49e   : > { %3020 = vrcp.f32 %v1862_v41 }
 0x49f   : > { %v3011_v58 = vpop.eup %3010  ;;  %v1858_v30 = vpop.xlane.xlu1 %1857 }
 0x4a0   : > { %v1864_v18 = vpop.xlane.xlu0 %1863  ;;  %3022 = vrcp.f32 %v1858_v30  ;;  %v3013_v51 = vpop.eup %3012 }
 0x4a1   : > { %3024 = vrcp.f32 %v1864_v18 }
 0x4a2   : > { %v3015_v36 = vpop.eup %3014 }
 0x4a3   : > { %v3017_v61 = vpop.eup %3016 }
 0x4a4   : > { %v1860_v24 = vpop.xlane.xlu0 %1859 }
 0x4a5   : > { %3026 = vrcp.f32 %v1860_v24 }
 0x4a7   : > { %v3019_v57 = vpop.eup %3018 }
 0x4a8   : > { %v3021_v26 = vpop.eup %3020 }
 0x4aa   : > { %v3023_v3 = vpop.eup %3022 }
 0x4ab   : > { %v3025_v0 = vpop.eup %3024 }
 0x4af   : > { %v3027_v38 = vpop.eup %3026 }
 0x4c3   : > { %v1870_v16 = vpop.xlane.xlu1 %1869 }
 0x4c4   : > { %3028 = vrcp.f32 %v1870_v16 }
 0x4c5   : > { %v1872_v45 = vpop.xlane.xlu0 %1871 }
 0x4c7   : > { %v1866_v53 = vpop.xlane.xlu1 %1865 }
 0x4c8   : > { %3030 = vrcp.f32 %v1866_v53 }
 0x4c9   : > { %v1868_v11 = vpop.xlane.xlu0 %1867  ;;  %3032 = vrcp.f32 %v1872_v45 }
 0x4ca   : > { %3034 = vrcp.f32 %v1868_v11 }
 0x4cb   : > { %v1878_v4 = vpop.xlane.xlu1 %1877 }
 0x4cc   : > { %3036 = vrcp.f32 %v1878_v4 }
 0x4cd   : > { %v1880_v50 = vpop.xlane.xlu0 %1879 }
 0x4ce   : > { %v3029_v19 = vpop.eup %3028 }
 0x4cf   : > { %v2544_v54 = vpop.f32.mrb[64].mxu1  ;;  %v1874_v43 = vpop.xlane.xlu1 %1873 }
 0x4d0   : > { %v2141_v37 = vmul.f32 %v2997_v42, %v2544_v54  ;;  %v1947_v35 = vpop.f32.mrb[65].mxu1  ;;  %3038 = vrcp.f32 %v1874_v43 }
 0x4d1   : > { %v2139_v44 = vmul.f32 %v2999_v23, %v1947_v35  ;;  %v2545_v49 = vpop.f32.mrb[66].mxu1  ;;  %v1876_v34 = vpop.xlane.xlu0 %1875  ;;  %3040 = vrcp.f32 %v1880_v50 }
 0x4d2   : > { %2173 = vst.msk [vmem:[%s4149_s15 + $0x10] sm:$0xff] %vm4236_vm0, %v2141_v37  ;;  %v2142_v2 = vmul.f32 %v3001_v10, %v2545_v49  ;;  %v1950_v40 = vpop.f32.mrb[67].mxu1  ;;  %v3031_v23 = vpop.eup %3030  ;;  %3042 = vrcp.f32 %v1876_v34 }
 0x4d3   : > { %2171 = vst.msk [vmem:[%s4149_s15] sm:$0xff] %vm4237_vm1, %v2139_v44  ;;  %v2140_v63 = vmul.f32 %v3003_v25, %v1950_v40  ;;  %v1886_v21 = vpop.xlane.xlu1 %1885  ;;  %v3033_v39 = vpop.eup %3032  ;;  %vm4252_vm1 = vmmov %vm4236_vm0 }
 0x4d4   : > { %2174 = vst.msk [vmem:[%s4149_s15 + $0x18] sm:$0xff] %vm4238_vm2, %v2142_v2  ;;  %v3035_v25 = vpop.eup %3034  ;;  %vm4253_vm2 = vmmov %vm4236_vm0  ;;  %3044 = vrcp.f32 %v1886_v21 }
 0x4d5   : > { %2172 = vst.msk [vmem:[%s4149_s15 + $0x8] sm:$0xff] %vm4239_vm3, %v2140_v63  ;;  %v1888_v6 = vpop.xlane.xlu0 %1887  ;;  %vm4254_vm3 = vmmov %vm4236_vm0 }
 0x4d6   : > { %v3037_v18 = vpop.eup %3036 }
 0x4d7   : > { %v2548_v13 = vpop.f32.mrb[68].mxu1  ;;  %v1882_v42 = vpop.xlane.xlu1 %1881 }
 0x4d8   : > { %v2145_v32 = vmul.f32 %v3005_v17, %v2548_v13  ;;  %v1963_v56 = vpop.f32.mrb[69].mxu1  ;;  %3046 = vrcp.f32 %v1882_v42 }
 0x4d9   : > { %v2143_v5 = vmul.f32 %v3007_v20, %v1963_v56  ;;  %v2549_v22 = vpop.f32.mrb[70].mxu1  ;;  %v1884_v37 = vpop.xlane.xlu0 %1883  ;;  %3048 = vrcp.f32 %v1888_v6 }
 0x4da   : > { %2177 = vst.msk [vmem:[%s4149_s15 + $0x30] sm:$0xff] %vm4240_vm4, %v2145_v32  ;;  %v2146_v60 = vmul.f32 %v3009_v27, %v2549_v22  ;;  %v1966_v55 = vpop.f32.mrb[71].mxu1  ;;  %v3039_v20 = vpop.eup %3038  ;;  %3050 = vrcp.f32 %v1884_v37  ;;  %vm4255_vm4 = vmmov %vm4236_vm0 }
 0x4db   : > { %2175 = vst.msk [vmem:[%s4149_s15 + $0x20] sm:$0xff] %vm4241_vm5, %v2143_v5  ;;  %v2144_v9 = vmul.f32 %v3011_v58, %v1966_v55  ;;  %v1890_v41 = vpop.xlane.xlu1 %1889  ;;  %v3041_v27 = vpop.eup %3040  ;;  %vm4256_vm5 = vmmov %vm4236_vm0 }
 0x4dc   : > { %2178 = vst.msk [vmem:[%s4149_s15 + $0x38] sm:$0xff] %vm4242_vm6, %v2146_v60  ;;  %v3043_v58 = vpop.eup %3042  ;;  %vm4257_vm6 = vmmov %vm4236_vm0 }
 0x4dd   : > { %2176 = vst.msk [vmem:[%s4149_s15 + $0x28] sm:$0xff] %vm4243_vm7, %v2144_v9  ;;  %v1892_v17 = vpop.xlane.xlu0 %1891  ;;  %vm4258_vm7 = vmmov %vm4236_vm0 }
 0x4df   : > { %v2552_v29 = vpop.f32.mrb[72].mxu1  ;;  %v1894_v60 = vpop.xlane.xlu1 %1893 }
 0x4e0   : > { %v2149_v47 = vmul.f32 %v3013_v51, %v2552_v29  ;;  %v1979_v8 = vpop.f32.mrb[73].mxu1  ;;  %3052 = vrcp.f32 %v1894_v60  ;;  %v3045_v51 = vpop.eup %3044 }
 0x4e1   : > { %v2147_v59 = vmul.f32 %v3015_v36, %v1979_v8  ;;  %v2553_v28 = vpop.f32.mrb[74].mxu1  ;;  %v1896_v24 = vpop.xlane.xlu0 %1895  ;;  %3054 = vrcp.f32 %v1890_v41 }
 0x4e2   : > { %2181 = vst.msk [vmem:[%s4149_s15 + $0x50] sm:$0xff] %vm4244_vm8, %v2149_v47  ;;  %v2150_v33 = vmul.f32 %v3017_v61, %v2553_v28  ;;  %v1982_v14 = vpop.f32.mrb[75].mxu1  ;;  %3056 = vrcp.f32 %v1896_v24  ;;  %v3047_v36 = vpop.eup %3046  ;;  %vm4259_vm8 = vmmov %vm4236_vm0 }
 0x4e3   : > { %2179 = vst.msk [vmem:[%s4149_s15 + $0x40] sm:$0xff] %vm4245_vm9, %v2147_v59  ;;  %v2148_v31 = vmul.f32 %v3019_v57, %v1982_v14  ;;  %3058 = vrcp.f32 %v1892_v17  ;;  %v3049_v61 = vpop.eup %3048  ;;  %vm4260_vm9 = vmmov %vm4236_vm0 }
 0x4e4   : > { %2182 = vst.msk [vmem:[%s4149_s15 + $0x58] sm:$0xff] %vm4246_vm10, %v2150_v33  ;;  %v3051_v57 = vpop.eup %3050  ;;  %vm4261_vm10 = vmmov %vm4236_vm0 }
 0x4e5   : > { %2180 = vst.msk [vmem:[%s4149_s15 + $0x48] sm:$0xff] %vm4247_vm11, %v2148_v31  ;;  %vm4262_vm11 = vmmov %vm4236_vm0 }
 0x4e8   : > { %v2556_v1 = vpop.f32.mrb[76].mxu1 }
 0x4e9   : > { %v2153_v62 = vmul.f32 %v3021_v26, %v2556_v1  ;;  %v1995_v48 = vpop.f32.mrb[77].mxu1 }
 0x4ea   : > { %v2151_v46 = vmul.f32 %v3023_v3, %v1995_v48  ;;  %v2557_v12 = vpop.f32.mrb[78].mxu1  ;;  %v3053_v26 = vpop.eup %3052 }
 0x4eb   : > { %2185 = vst.msk [vmem:[%s4149_s15 + $0x70] sm:$0xff] %vm4248_vm12, %v2153_v62  ;;  %v2154_v52 = vmul.f32 %v3025_v0, %v2557_v12  ;;  %v1998_v7 = vpop.f32.mrb[79].mxu1  ;;  %v3055_v3 = vpop.eup %3054  ;;  %vm4263_vm12 = vmmov %vm4236_vm0 }
 0x4ec   : > { %2183 = vst.msk [vmem:[%s4149_s15 + $0x60] sm:$0xff] %vm4249_vm13, %v2151_v46  ;;  %v2152_v15 = vmul.f32 %v3027_v38, %v1998_v7  ;;  %v3057_v0 = vpop.eup %3056  ;;  %vm4264_vm13 = vmmov %vm4236_vm0 }
 0x4ed   : > { %2186 = vst.msk [vmem:[%s4149_s15 + $0x78] sm:$0xff] %vm4250_vm14, %v2154_v52  ;;  %v3059_v38 = vpop.eup %3058  ;;  %vm4265_vm14 = vmmov %vm4236_vm0 }
 0x4ee   : > { %2184 = vst.msk [vmem:[%s4149_s15 + $0x68] sm:$0xff] %vm4251_vm15, %v2152_v15  ;;  %vm4266_vm15 = vmmov %vm4236_vm0 }
 0x50d   : > { %v2576_v54 = vpop.f32.mrb[80].mxu1 }
 0x50e   : > { %v2157_v35 = vmul.f32 %v3029_v19, %v2576_v54  ;;  %v2044_v10 = vpop.f32.mrb[81].mxu1 }
 0x50f   : > { %v2155_v44 = vmul.f32 %v3031_v23, %v2044_v10  ;;  %v2577_v49 = vpop.f32.mrb[82].mxu1 }
 0x510   : > { %2189 = vst.msk [vmem:[%s4149_s15 + $0x90] sm:$0xff] %vm4236_vm0, %v2157_v35  ;;  %v2158_v2 = vmul.f32 %v3033_v39, %v2577_v49  ;;  %v2047_v40 = vpop.f32.mrb[83].mxu1 }
 0x511   : > { %2187 = vst.msk [vmem:[%s4149_s15 + $0x80] sm:$0xff] %vm4252_vm1, %v2155_v44  ;;  %v2156_v63 = vmul.f32 %v3035_v25, %v2047_v40 }
 0x512   : > { %2190 = vst.msk [vmem:[%s4149_s15 + $0x98] sm:$0xff] %vm4253_vm2, %v2158_v2 }
 0x513   : > { %2188 = vst.msk [vmem:[%s4149_s15 + $0x88] sm:$0xff] %vm4254_vm3, %v2156_v63 }
 0x515   : > { %v2580_v13 = vpop.f32.mrb[84].mxu1 }
 0x516   : > { %v2161_v32 = vmul.f32 %v3037_v18, %v2580_v13  ;;  %v2060_v56 = vpop.f32.mrb[85].mxu1 }
 0x517   : > { %v2159_v5 = vmul.f32 %v3039_v20, %v2060_v56  ;;  %v2581_v22 = vpop.f32.mrb[86].mxu1 }
 0x518   : > { %2193 = vst.msk [vmem:[%s4149_s15 + $0xb0] sm:$0xff] %vm4255_vm4, %v2161_v32  ;;  %v2162_v55 = vmul.f32 %v3041_v27, %v2581_v22  ;;  %v2063_v30 = vpop.f32.mrb[87].mxu1 }
 0x519   : > { %2191 = vst.msk [vmem:[%s4149_s15 + $0xa0] sm:$0xff] %vm4256_vm5, %v2159_v5  ;;  %v2160_v9 = vmul.f32 %v3043_v58, %v2063_v30 }
 0x51a   : > { %2194 = vst.msk [vmem:[%s4149_s15 + $0xb8] sm:$0xff] %vm4257_vm6, %v2162_v55 }
 0x51b   : > { %2192 = vst.msk [vmem:[%s4149_s15 + $0xa8] sm:$0xff] %vm4258_vm7, %v2160_v9 }
 0x51d   : > { %v2584_v29 = vpop.f32.mrb[88].mxu1 }
 0x51e   : > { %v2165_v47 = vmul.f32 %v3045_v51, %v2584_v29  ;;  %v2076_v8 = vpop.f32.mrb[89].mxu1 }
 0x51f   : > { %v2163_v59 = vmul.f32 %v3047_v36, %v2076_v8  ;;  %v2585_v28 = vpop.f32.mrb[90].mxu1 }
 0x520   : > { %2197 = vst.msk [vmem:[%s4149_s15 + $0xd0] sm:$0xff] %vm4259_vm8, %v2165_v47  ;;  %v2166_v33 = vmul.f32 %v3049_v61, %v2585_v28  ;;  %v2079_v14 = vpop.f32.mrb[91].mxu1 }
 0x521   : > { %2195 = vst.msk [vmem:[%s4149_s15 + $0xc0] sm:$0xff] %vm4260_vm9, %v2163_v59  ;;  %v2164_v31 = vmul.f32 %v3051_v57, %v2079_v14 }
 0x522   : > { %2198 = vst.msk [vmem:[%s4149_s15 + $0xd8] sm:$0xff] %vm4261_vm10, %v2166_v33 }
 0x523   : > { %2196 = vst.msk [vmem:[%s4149_s15 + $0xc8] sm:$0xff] %vm4262_vm11, %v2164_v31 }
 0x525   : > { %v2588_v1 = vpop.f32.mrb[92].mxu1 }
 0x526   : > { %v2169_v62 = vmul.f32 %v3053_v26, %v2588_v1  ;;  %v2092_v48 = vpop.f32.mrb[93].mxu1 }
 0x527   : > { %v2167_v46 = vmul.f32 %v3055_v3, %v2092_v48  ;;  %v2589_v12 = vpop.f32.mrb[94].mxu1 }
 0x528   : > { %2201 = vst.msk [vmem:[%s4149_s15 + $0xf0] sm:$0xff] %vm4263_vm12, %v2169_v62  ;;  %v2170_v52 = vmul.f32 %v3057_v0, %v2589_v12  ;;  %v2095_v7 = vpop.f32.mrb[95].mxu1 }
 0x529   : > { %2199 = vst.msk [vmem:[%s4149_s15 + $0xe0] sm:$0xff] %vm4264_vm13, %v2167_v46  ;;  %v2168_v15 = vmul.f32 %v3059_v38, %v2095_v7 }
 0x52a   : > { %2202 = vst.msk [vmem:[%s4149_s15 + $0xf8] sm:$0xff] %vm4265_vm14, %v2170_v52 }
 0x52b   : > { %2200 = vst.msk [vmem:[%s4149_s15 + $0xe8] sm:$0xff] %vm4266_vm15, %v2168_v15 }
 0x52c PF: > { %p13_p8 = scmp.ge.s32.totalorder %s3171_s17, 4   ;;  %s4267_s12 = smov %s3116_s13 }
 0x52d   : > { %s4268_s13 = smov %s3120_s14  ;;  %s4269_s14 = smov %s3181_s20 }
 0x52e   : > { %s4270_s15 = smov %s3171_s17  ;;  %15 = sbr.rel (!%p13_p8) target bundleno = 3 (0x3), region = 72 }
 0x535   :  { %2227 = vsyncpa [#allocation3], 1 }
 0x536   :  { %2229 = vsyncpa [#allocation3 + $0x1], 1 }

</bundles_post_ra>
